<compile_context>
chip_gen: v7x
topology: tpu7x:2x2x1
jax: 0.10.0
libtpu: 0.0.40
codegen_flags: <defaults>
</compile_context>

<pallas_src>
import functools

import jax
import jax.numpy as jnp
from jax.experimental import pallas as pl
from jax.experimental.pallas import tpu as pltpu


def _round_up(v, m):
    return (v + m - 1) // m * m


def _pick_tile_i(N, Hp, budget_bytes=10 << 20):
    """Largest i-tile (multiple of 8 or full N) whose double-buffered edge
    tiles (2 in + 2 out) fit in the VMEM budget."""
    cands = [t for t in range(8, N, 8) if N % t == 0] + [N]
    fitting = [t for t in cands if 4 * t * N * Hp * 4 <= budget_bytes]
    return max(fitting) if fitting else min(cands)


# ---------------------------------------------------------------------------
# Pass 1 (stats pass): gated edge features + node aggregation + per-tile
# BatchNorm partial statistics.  Does NOT write the big e_tmp tensor to HBM.
# ---------------------------------------------------------------------------
def _stats_kernel(x_all_ref, x_tile_ref, e_ref,
                  wu_e_ref, bu_e_ref, wv_e_ref, bv_e_ref,
                  wcat_ref, bcat_ref,
                  x_tmp_ref, stats_ref):
    ti, n, hp = e_ref.shape[1], e_ref.shape[2], e_ref.shape[3]

    x_all = x_all_ref[0]                         # (N, Hp)   all nodes of batch b
    x_t = x_tile_ref[0]                          # (ti, Hp)  nodes of this i-tile
    e_t = e_ref[0]                               # (ti, N, Hp)

    # V*x_j for every node j (edge "column" term), single MXU matmul.
    vx_all = jnp.dot(x_all, wv_e_ref[...],
                     preferred_element_type=jnp.float32) + bv_e_ref[...]

    # Fused node matmul for the i-tile: concat weights [V_e | U_n | V_n].
    t3 = jnp.dot(x_t, wcat_ref[...],
                 preferred_element_type=jnp.float32) + bcat_ref[...]
    vx_i = t3[:, :hp]
    ux_i = t3[:, hp:2 * hp]
    vxn_i = t3[:, 2 * hp:3 * hp]

    # U*e for the whole i-tile of edges.
    ue = jnp.dot(e_t.reshape(ti * n, hp), wu_e_ref[...],
                 preferred_element_type=jnp.float32) + bu_e_ref[...]
    e_tmp = ue.reshape(ti, n, hp) + vx_all[None, :, :] + vx_i[:, None, :]

    gate = jax.nn.sigmoid(e_tmp)                 # EUP transcendental
    gate_sum = jnp.sum(gate, axis=1)             # sum over j -> (ti, Hp)
    x_tmp = ux_i + vxn_i * gate_sum              # aggregation='sum'
    x_tmp_ref[0] = x_tmp

    # Per-tile BatchNorm partial statistics (sum / sum of squares per channel).
    e_flat = e_tmp.reshape(ti * n, hp)
    sum_e = jnp.sum(e_flat, axis=0, keepdims=True)
    ssq_e = jnp.sum(e_flat * e_flat, axis=0, keepdims=True)
    sum_x = jnp.sum(x_tmp, axis=0, keepdims=True)
    ssq_x = jnp.sum(x_tmp * x_tmp, axis=0, keepdims=True)
    stats_ref[0, 0] = jnp.concatenate([sum_e, ssq_e, sum_x, ssq_x], axis=0)


# ---------------------------------------------------------------------------
# Pass 2 (apply pass): recompute e_tmp, BatchNorm affine (global stats) +
# ReLU + residual.  Edge output is aliased onto the edge input.
# ---------------------------------------------------------------------------
def _apply_kernel(ss_ref, x_all_ref, x_tile_ref, e_in_ref, x_tmp_ref,
                  wu_e_ref, bu_e_ref, wv_e_ref, bv_e_ref,
                  e_out_ref, x_out_ref):
    ti, n, hp = e_in_ref.shape[1], e_in_ref.shape[2], e_in_ref.shape[3]

    a_e = ss_ref[0:1, :]
    c_e = ss_ref[1:2, :]
    a_x = ss_ref[2:3, :]
    c_x = ss_ref[3:4, :]

    x_all = x_all_ref[0]                         # (N, Hp)
    x_t = x_tile_ref[0]                          # (ti, Hp)  (residual input)
    e_in = e_in_ref[0]                           # (ti, N, Hp)

    # Recompute pre-BN edge features (no sigmoid needed here).
    vx_all = jnp.dot(x_all, wv_e_ref[...],
                     preferred_element_type=jnp.float32) + bv_e_ref[...]
    vx_i = jnp.dot(x_t, wv_e_ref[...],
                   preferred_element_type=jnp.float32) + bv_e_ref[...]
    ue = jnp.dot(e_in.reshape(ti * n, hp), wu_e_ref[...],
                 preferred_element_type=jnp.float32) + bu_e_ref[...]
    e_tmp = ue.reshape(ti, n, hp) + vx_all[None, :, :] + vx_i[:, None, :]

    e_out_ref[0] = e_in + jnp.maximum(e_tmp * a_e + c_e, 0.0)
    x_out_ref[0] = x_t + jnp.maximum(x_tmp_ref[0] * a_x + c_x, 0.0)


# ---------------------------------------------------------------------------
# One ResidualGatedGCNLayer on channel-padded, channels-last tensors.
# ---------------------------------------------------------------------------
def _gcn_layer_padded(xp, ep, P, tile_i):
    B, N, Hp = xp.shape
    n_i = N // tile_i
    grid = (B, n_i)
    f32 = jnp.float32
    par = pltpu.CompilerParams(dimension_semantics=("parallel", "parallel"))

    # ---- Pass 1: stats -----------------------------------------------------
    x_tmp, stats = pl.pallas_call(
        _stats_kernel,
        out_shape=(jax.ShapeDtypeStruct((B, N, Hp), f32),
                   jax.ShapeDtypeStruct((B, n_i, 4, Hp), f32)),
        grid=grid,
        in_specs=[
            pl.BlockSpec((1, N, Hp), lambda b, i: (b, 0, 0)),             # x (all j)
            pl.BlockSpec((1, tile_i, Hp), lambda b, i: (b, i, 0)),        # x (i-tile)
            pl.BlockSpec((1, tile_i, N, Hp), lambda b, i: (b, i, 0, 0)),  # e tile
            pl.BlockSpec((Hp, Hp), lambda b, i: (0, 0)),                  # Wu_e
            pl.BlockSpec((1, Hp), lambda b, i: (0, 0)),                   # bu_e
            pl.BlockSpec((Hp, Hp), lambda b, i: (0, 0)),                  # Wv_e
            pl.BlockSpec((1, Hp), lambda b, i: (0, 0)),                   # bv_e
            pl.BlockSpec((Hp, 3 * Hp), lambda b, i: (0, 0)),              # [Ve|Un|Vn]
            pl.BlockSpec((1, 3 * Hp), lambda b, i: (0, 0)),               # biases
        ],
        out_specs=(
            pl.BlockSpec((1, tile_i, Hp), lambda b, i: (b, i, 0)),
            pl.BlockSpec((1, 1, 4, Hp), lambda b, i: (b, i, 0, 0)),
        ),
        compiler_params=par,
    )(xp, xp, ep, P["wu_e"], P["bu_e"], P["wv_e"], P["bv_e"],
      P["wcat"], P["bcat"])

    # ---- Finalize GLOBAL BatchNorm statistics (tiny reduction, plain JAX) --
    s = jnp.sum(stats, axis=(0, 1))              # (4, Hp)
    cnt_e = float(B * N * N)
    cnt_x = float(B * N)
    eps = 1e-5
    mean_e = s[0] / cnt_e
    var_e = jnp.maximum(s[1] / cnt_e - mean_e * mean_e, 0.0)
    mean_x = s[2] / cnt_x
    var_x = jnp.maximum(s[3] / cnt_x - mean_x * mean_x, 0.0)
    a_e = P["gamma_e"] * jax.lax.rsqrt(var_e + eps)
    c_e = P["beta_e"] - a_e * mean_e
    a_x = P["gamma_n"] * jax.lax.rsqrt(var_x + eps)
    c_x = P["beta_n"] - a_x * mean_x
    ss = jnp.stack([a_e, c_e, a_x, c_x], axis=0)  # (4, Hp)

    # ---- Pass 2: apply (recompute + BN + ReLU + residual) ------------------
    e_new, x_new = pl.pallas_call(
        _apply_kernel,
        out_shape=(jax.ShapeDtypeStruct((B, N, N, Hp), f32),
                   jax.ShapeDtypeStruct((B, N, Hp), f32)),
        grid=grid,
        in_specs=[
            pl.BlockSpec((4, Hp), lambda b, i: (0, 0)),                   # scale/shift
            pl.BlockSpec((1, N, Hp), lambda b, i: (b, 0, 0)),             # x (all j)
            pl.BlockSpec((1, tile_i, Hp), lambda b, i: (b, i, 0)),        # x (i-tile)
            pl.BlockSpec((1, tile_i, N, Hp), lambda b, i: (b, i, 0, 0)),  # e tile
            pl.BlockSpec((1, tile_i, Hp), lambda b, i: (b, i, 0)),        # x_tmp tile
            pl.BlockSpec((Hp, Hp), lambda b, i: (0, 0)),                  # Wu_e
            pl.BlockSpec((1, Hp), lambda b, i: (0, 0)),                   # bu_e
            pl.BlockSpec((Hp, Hp), lambda b, i: (0, 0)),                  # Wv_e
            pl.BlockSpec((1, Hp), lambda b, i: (0, 0)),                   # bv_e
        ],
        out_specs=(
            pl.BlockSpec((1, tile_i, N, Hp), lambda b, i: (b, i, 0, 0)),
            pl.BlockSpec((1, tile_i, Hp), lambda b, i: (b, i, 0)),
        ),
        input_output_aliases={3: 0},             # e_new written in place over e
        compiler_params=par,
    )(ss, xp, xp, ep, x_tmp, P["wu_e"], P["bu_e"], P["wv_e"], P["bv_e"])
    return x_new, e_new


# ---------------------------------------------------------------------------
# Parameter preparation (pad to lane-dense Hp, pre-transpose, fuse weights).
# ---------------------------------------------------------------------------
def _prepare_layer_params(p, H, Hp):
    f32 = jnp.float32

    def pad_w(w):  # PyTorch (out, in) -> padded (in, out) so kernel does x @ W
        return jnp.zeros((Hp, Hp), f32).at[:H, :H].set(w.T.astype(f32))

    def pad_b(b):
        return jnp.zeros((1, Hp), f32).at[0, :H].set(b.astype(f32))

    def pad_v(v):
        return jnp.zeros((Hp,), f32).at[:H].set(v.astype(f32))

    wv_e = pad_w(p["wv_e"]); bv_e = pad_b(p["bv_e"])
    wu_n = pad_w(p["wu_n"]); bu_n = pad_b(p["bu_n"])
    wv_n = pad_w(p["wv_n"]); bv_n = pad_b(p["bv_n"])
    return dict(
        wu_e=pad_w(p["wu_e"]), bu_e=pad_b(p["bu_e"]),
        wv_e=wv_e, bv_e=bv_e,
        wcat=jnp.concatenate([wv_e, wu_n, wv_n], axis=1),   # (Hp, 3Hp)
        bcat=jnp.concatenate([bv_e, bu_n, bv_n], axis=1),   # (1, 3Hp)
        gamma_e=pad_v(p["gamma_e"]), beta_e=pad_v(p["beta_e"]),
        gamma_n=pad_v(p["gamma_n"]), beta_n=pad_v(p["beta_n"]),
    )


# ---------------------------------------------------------------------------
# ResidualGatedGCNModel forward (return_u_mat=False, add_graph_dim == 0 path).
# ---------------------------------------------------------------------------
def residual_gated_gcn_model(x, e, layer_params, tile_i=None):
    """x: (B, N, H) node embeddings, e: (B, N, N, H) edge embeddings
    (channels-last, exactly as ResidualGatedGCNModel.forward receives them)."""
    B, N, H = x.shape
    Hp = _round_up(max(H, 128), 128)             # lane-dense channel dim
    if tile_i is None:
        tile_i = _pick_tile_i(N, Hp)
    assert N % tile_i == 0 and (tile_i == N or tile_i % 8 == 0)

    f32 = jnp.float32
    if Hp == H:
        xp = x.astype(f32)
        ep = e.astype(f32)
    else:
        xp = jnp.zeros((B, N, Hp), f32).at[..., :H].set(x.astype(f32))
        ep = jnp.zeros((B, N, N, Hp), f32).at[..., :H].set(e.astype(f32))

    for p in layer_params:
        P = _prepare_layer_params(p, H, Hp)
        xp, ep = _gcn_layer_padded(xp, ep, P, tile_i)

    h = xp[..., :H]
    e_out = ep[..., :H]
    graph_embed = jnp.mean(h, axis=1)            # add_graph_dim == 0 path
    return {"embeddings": h, "edge_embeddings": e_out, "graph_embed": graph_embed}


# ---------------------------------------------------------------------------
# Pure-JAX reference (mirrors the PyTorch module exactly) for verification.
# ---------------------------------------------------------------------------
def _layer_reference(x, e, p):
    def lin(z, w, b):  # 1x1 conv with PyTorch (out, in) weight
        return jnp.einsum("...h,oh->...o", z, w) + b

    vx = lin(x, p["wv_e"], p["bv_e"])
    ue = lin(e, p["wu_e"], p["bu_e"])
    e_tmp = ue + vx[:, None, :, :] + vx[:, :, None, :]
    gate = jax.nn.sigmoid(e_tmp)
    ux = lin(x, p["wu_n"], p["bu_n"])
    vxn = lin(x, p["wv_n"], p["bv_n"])
    x_tmp = ux + vxn * jnp.sum(gate, axis=2)     # aggregation='sum'

    def bn(z, g, b, axes):
        m = jnp.mean(z, axis=axes, keepdims=True)
        v = jnp.mean((z - m) ** 2, axis=axes, keepdims=True)
        return (z - m) * jax.lax.rsqrt(v + 1e-5) * g + b

    e_bn = bn(e_tmp, p["gamma_e"], p["beta_e"], (0, 1, 2))
    x_bn = bn(x_tmp, p["gamma_n"], p["beta_n"], (0, 1))
    return x + jnp.maximum(x_bn, 0.0), e + jnp.maximum(e_bn, 0.0)


def _model_reference(x, e, layer_params):
    for p in layer_params:
        x, e = _layer_reference(x, e, p)
    return {"embeddings": x, "edge_embeddings": e,
            "graph_embed": jnp.mean(x, axis=1)}


def init_layer_params(key, H):
    ks = jax.random.split(key, 8)
    s = 1.0 / float(H) ** 0.5

    def w(k):
        return jax.random.uniform(k, (H, H), jnp.float32, -s, s)

    def b(k):
        return jax.random.uniform(k, (H,), jnp.float32, -s, s)

    return dict(
        wu_e=w(ks[0]), bu_e=b(ks[1]),            # EdgeFeatures.U (Conv2d 1x1)
        wv_e=w(ks[2]), bv_e=b(ks[3]),            # EdgeFeatures.V (Conv1d k=1)
        wu_n=w(ks[4]), bu_n=b(ks[5]),            # NodeFeatures.U
        wv_n=w(ks[6]), bv_n=b(ks[7]),            # NodeFeatures.V
        gamma_e=jnp.ones((H,), jnp.float32), beta_e=jnp.zeros((H,), jnp.float32),
        gamma_n=jnp.ones((H,), jnp.float32), beta_n=jnp.zeros((H,), jnp.float32),
    )


if __name__ == "__main__":
    B, N, H, n_layers = 2, 16, 32, 2             # batch, num_nodes, embed_dim
    key = jax.random.PRNGKey(0)
    kx, ke, kp = jax.random.split(key, 3)

    # Model-level (channels-last) inputs, matching ResidualGatedGCNModel.forward.
    x = jax.random.normal(kx, (B, N, H), jnp.float32)
    e = jax.random.normal(ke, (B, N, N, H), jnp.float32)
    layer_params = [init_layer_params(k, H) for k in jax.random.split(kp, n_layers)]

    run = jax.jit(functools.partial(residual_gated_gcn_model, tile_i=None))
    out = run(x, e, layer_params)
    jax.block_until_ready(out)

    ref = _model_reference(x, e, layer_params)
    assert out["embeddings"].shape == (B, N, H)
    assert out["edge_embeddings"].shape == (B, N, N, H)
    assert out["graph_embed"].shape == (B, H)
    assert jnp.allclose(out["embeddings"], ref["embeddings"],
                        atol=2e-3, rtol=2e-3), "node features mismatch"
    assert jnp.allclose(out["edge_embeddings"], ref["edge_embeddings"],
                        atol=2e-3, rtol=2e-3), "edge features mismatch"
    assert jnp.allclose(out["graph_embed"], ref["graph_embed"],
                        atol=2e-3, rtol=2e-3), "graph embedding mismatch"
    print("KERNEL_OK")
</pallas_src>

<mosaic_0001>
module attributes {stable_mosaic.version = 11 : i64} {
  func.func @_stats_kernel(%arg0: i32, %arg1: i32, %arg2: memref<1x16x128xf32, #tpu.memory_space<vmem>>, %arg3: memref<1x16x128xf32, #tpu.memory_space<vmem>>, %arg4: memref<1x16x16x128xf32, #tpu.memory_space<vmem>>, %arg5: memref<128x128xf32, #tpu.memory_space<vmem>>, %arg6: memref<1x128xf32, #tpu.memory_space<vmem>>, %arg7: memref<128x128xf32, #tpu.memory_space<vmem>>, %arg8: memref<1x128xf32, #tpu.memory_space<vmem>>, %arg9: memref<128x384xf32, #tpu.memory_space<vmem>>, %arg10: memref<1x384xf32, #tpu.memory_space<vmem>>, %arg11: memref<1x16x128xf32, #tpu.memory_space<vmem>>, %arg12: memref<1x1x4x128xf32, #tpu.memory_space<vmem>>) attributes {dimension_semantics = [#tpu.dimension_semantics<parallel>, #tpu.dimension_semantics<parallel>], iteration_bounds = array<i64: 2, 1>, scalar_prefetch = 0 : i64, scratch_operands = 0 : i64, tpu.core_type = #tpu.core_type<tc>, window_params = [{transform_indices = @transform_0, window_bounds = array<i64: 1, 16, 128>}, {transform_indices = @transform_1, window_bounds = array<i64: 1, 16, 128>}, {transform_indices = @transform_2, window_bounds = array<i64: 1, 16, 16, 128>}, {pipeline_mode = #tpu.pipeline_mode<synchronous>, transform_indices = @transform_3, window_bounds = array<i64: 128, 128>}, {pipeline_mode = #tpu.pipeline_mode<synchronous>, transform_indices = @transform_4, window_bounds = array<i64: 1, 128>}, {pipeline_mode = #tpu.pipeline_mode<synchronous>, transform_indices = @transform_5, window_bounds = array<i64: 128, 128>}, {pipeline_mode = #tpu.pipeline_mode<synchronous>, transform_indices = @transform_6, window_bounds = array<i64: 1, 128>}, {pipeline_mode = #tpu.pipeline_mode<synchronous>, transform_indices = @transform_7, window_bounds = array<i64: 128, 384>}, {pipeline_mode = #tpu.pipeline_mode<synchronous>, transform_indices = @transform_8, window_bounds = array<i64: 1, 384>}, {transform_indices = @transform_9, window_bounds = array<i64: 1, 16, 128>}, {transform_indices = @transform_10, window_bounds = array<i64: 1, 1, 4, 128>}]} {
    %c0 = arith.constant 0 : index
    %c0_0 = arith.constant 0 : index
    %c0_1 = arith.constant 0 : index
    %0 = vector.load %arg2[%c0, %c0_0, %c0_1] : memref<1x16x128xf32, #tpu.memory_space<vmem>>, vector<1x16x128xf32>
    %1 = vector.shape_cast %0 : vector<1x16x128xf32> to vector<16x128xf32>
    %c0_2 = arith.constant 0 : index
    %c0_3 = arith.constant 0 : index
    %c0_4 = arith.constant 0 : index
    %2 = vector.load %arg3[%c0_2, %c0_3, %c0_4] : memref<1x16x128xf32, #tpu.memory_space<vmem>>, vector<1x16x128xf32>
    %3 = vector.shape_cast %2 : vector<1x16x128xf32> to vector<16x128xf32>
    %c0_5 = arith.constant 0 : index
    %c0_6 = arith.constant 0 : index
    %c0_7 = arith.constant 0 : index
    %c0_8 = arith.constant 0 : index
    %4 = vector.load %arg4[%c0_5, %c0_6, %c0_7, %c0_8] : memref<1x16x16x128xf32, #tpu.memory_space<vmem>>, vector<1x16x16x128xf32>
    %5 = vector.shape_cast %4 : vector<1x16x16x128xf32> to vector<16x16x128xf32>
    %c0_9 = arith.constant 0 : index
    %c0_10 = arith.constant 0 : index
    %6 = vector.load %arg7[%c0_9, %c0_10] : memref<128x128xf32, #tpu.memory_space<vmem>>, vector<128x128xf32>
    %cst = arith.constant dense<0.000000e+00> : vector<16x128xf32>
    %7 = tpu.matmul %1, %6, %cst {dimension_numbers = #tpu.dot_dimension_numbers<[1], [0], [0], [1], [0, 0, 1, 1], [], []>} : vector<16x128xf32>, vector<128x128xf32>, vector<16x128xf32> -> vector<16x128xf32>
    %c0_11 = arith.constant 0 : index
    %c0_12 = arith.constant 0 : index
    %8 = vector.load %arg8[%c0_11, %c0_12] : memref<1x128xf32, #tpu.memory_space<vmem>>, vector<1x128xf32>
    %9 = vector.broadcast %8 : vector<1x128xf32> to vector<16x128xf32>
    %10 = arith.addf %7, %9 : vector<16x128xf32>
    %c0_13 = arith.constant 0 : index
    %c0_14 = arith.constant 0 : index
    %11 = vector.load %arg9[%c0_13, %c0_14] : memref<128x384xf32, #tpu.memory_space<vmem>>, vector<128x384xf32>
    %cst_15 = arith.constant dense<0.000000e+00> : vector<16x384xf32>
    %12 = tpu.matmul %3, %11, %cst_15 {dimension_numbers = #tpu.dot_dimension_numbers<[1], [0], [0], [1], [0, 0, 1, 1], [], []>} : vector<16x128xf32>, vector<128x384xf32>, vector<16x384xf32> -> vector<16x384xf32>
    %c0_16 = arith.constant 0 : index
    %c0_17 = arith.constant 0 : index
    %13 = vector.load %arg10[%c0_16, %c0_17] : memref<1x384xf32, #tpu.memory_space<vmem>>, vector<1x384xf32>
    %14 = vector.broadcast %13 : vector<1x384xf32> to vector<16x384xf32>
    %15 = arith.addf %12, %14 : vector<16x384xf32>
    %16 = vector.extract_strided_slice %15 {offsets = [0, 0], sizes = [16, 128], strides = [1, 1]} : vector<16x384xf32> to vector<16x128xf32>
    %17 = vector.extract_strided_slice %15 {offsets = [0, 128], sizes = [16, 128], strides = [1, 1]} : vector<16x384xf32> to vector<16x128xf32>
    %18 = vector.extract_strided_slice %15 {offsets = [0, 256], sizes = [16, 128], strides = [1, 1]} : vector<16x384xf32> to vector<16x128xf32>
    %19 = vector.shape_cast %5 : vector<16x16x128xf32> to vector<256x128xf32>
    %c0_18 = arith.constant 0 : index
    %c0_19 = arith.constant 0 : index
    %20 = vector.load %arg5[%c0_18, %c0_19] : memref<128x128xf32, #tpu.memory_space<vmem>>, vector<128x128xf32>
    %cst_20 = arith.constant dense<0.000000e+00> : vector<256x128xf32>
    %21 = tpu.matmul %19, %20, %cst_20 {dimension_numbers = #tpu.dot_dimension_numbers<[1], [0], [0], [1], [0, 0, 1, 1], [], []>} : vector<256x128xf32>, vector<128x128xf32>, vector<256x128xf32> -> vector<256x128xf32>
    %c0_21 = arith.constant 0 : index
    %c0_22 = arith.constant 0 : index
    %22 = vector.load %arg6[%c0_21, %c0_22] : memref<1x128xf32, #tpu.memory_space<vmem>>, vector<1x128xf32>
    %23 = vector.broadcast %22 : vector<1x128xf32> to vector<256x128xf32>
    %24 = arith.addf %21, %23 : vector<256x128xf32>
    %25 = vector.shape_cast %24 : vector<256x128xf32> to vector<16x16x128xf32>
    %26 = vector.shape_cast %10 : vector<16x128xf32> to vector<1x16x128xf32>
    %27 = vector.broadcast %26 : vector<1x16x128xf32> to vector<16x16x128xf32>
    %28 = arith.addf %25, %27 : vector<16x16x128xf32>
    %29 = vector.shape_cast %16 : vector<16x128xf32> to vector<16x1x128xf32>
    %30 = vector.broadcast %29 : vector<16x1x128xf32> to vector<16x16x128xf32>
    %31 = arith.addf %28, %30 : vector<16x16x128xf32>
    %32 = arith.negf %31 : vector<16x16x128xf32>
    %33 = math.exp %32 : vector<16x16x128xf32>
    %cst_23 = arith.constant 1.000000e+00 : f32
    %34 = vector.broadcast %cst_23 : f32 to vector<16x16x128xf32>
    %35 = arith.addf %34, %33 : vector<16x16x128xf32>
    %36 = arith.divf %34, %35 : vector<16x16x128xf32>
    %cst_24 = arith.constant dense<0.000000e+00> : vector<16x128xf32>
    %37 = vector.multi_reduction <add>, %36, %cst_24 [1] : vector<16x16x128xf32> to vector<16x128xf32>
    %38 = arith.mulf %18, %37 : vector<16x128xf32>
    %39 = arith.addf %17, %38 : vector<16x128xf32>
    %c0_25 = arith.constant 0 : index
    %c0_26 = arith.constant 0 : index
    %c0_27 = arith.constant 0 : index
    %40 = vector.load %arg11[%c0_25, %c0_26, %c0_27] : memref<1x16x128xf32, #tpu.memory_space<vmem>>, vector<1x16x128xf32>
    %41 = vector.shape_cast %40 : vector<1x16x128xf32> to vector<16x128xf32>
    %42 = vector.shape_cast %39 : vector<16x128xf32> to vector<1x16x128xf32>
    tpu.vector_store %arg11[%c0_25, %c0_26, %c0_27], %42 {strides = array<i32>} : memref<1x16x128xf32, #tpu.memory_space<vmem>>, vector<1x16x128xf32>,
    %43 = vector.shape_cast %31 : vector<16x16x128xf32> to vector<256x128xf32>
    %cst_28 = arith.constant dense<0.000000e+00> : vector<128xf32>
    %44 = vector.multi_reduction <add>, %43, %cst_28 [0] : vector<256x128xf32> to vector<128xf32>
    %45 = vector.shape_cast %44 : vector<128xf32> to vector<1x128xf32>
    %46 = arith.mulf %43, %43 : vector<256x128xf32>
    %cst_29 = arith.constant dense<0.000000e+00> : vector<128xf32>
    %47 = vector.multi_reduction <add>, %46, %cst_29 [0] : vector<256x128xf32> to vector<128xf32>
    %48 = vector.shape_cast %47 : vector<128xf32> to vector<1x128xf32>
    %cst_30 = arith.constant dense<0.000000e+00> : vector<128xf32>
    %49 = vector.multi_reduction <add>, %39, %cst_30 [0] : vector<16x128xf32> to vector<128xf32>
    %50 = vector.shape_cast %49 : vector<128xf32> to vector<1x128xf32>
    %51 = arith.mulf %39, %39 : vector<16x128xf32>
    %cst_31 = arith.constant dense<0.000000e+00> : vector<128xf32>
    %52 = vector.multi_reduction <add>, %51, %cst_31 [0] : vector<16x128xf32> to vector<128xf32>
    %53 = vector.shape_cast %52 : vector<128xf32> to vector<1x128xf32>
    %54 = tpu.concatenate %45, %48, %50, %53 in 0 : vector<1x128xf32>, vector<1x128xf32>, vector<1x128xf32>, vector<1x128xf32> -> vector<4x128xf32>
    %c0_32 = arith.constant 0 : index
    %c0_33 = arith.constant 0 : index
    %c0_34 = arith.constant 0 : index
    %c0_35 = arith.constant 0 : index
    %55 = vector.load %arg12[%c0_32, %c0_33, %c0_34, %c0_35] : memref<1x1x4x128xf32, #tpu.memory_space<vmem>>, vector<1x1x4x128xf32>
    %56 = vector.shape_cast %55 : vector<1x1x4x128xf32> to vector<4x128xf32>
    %57 = vector.shape_cast %54 : vector<4x128xf32> to vector<1x1x4x128xf32>
    tpu.vector_store %arg12[%c0_32, %c0_33, %c0_34, %c0_35], %57 {strides = array<i32>} : memref<1x1x4x128xf32, #tpu.memory_space<vmem>>, vector<1x1x4x128xf32>,
    return
  }
  func.func @transform_0(%arg0: i32, %arg1: i32) -> (i32, i32, i32) {
    %c0_i32 = arith.constant 0 : i32
    %c0_i32_0 = arith.constant 0 : i32
    %c0_i32_1 = arith.constant 0 : i32
    return %arg0, %c0_i32, %c0_i32_0 : i32, i32, i32
  }
  func.func @transform_1(%arg0: i32, %arg1: i32) -> (i32, i32, i32) {
    %c0_i32 = arith.constant 0 : i32
    %c0_i32_0 = arith.constant 0 : i32
    return %arg0, %arg1, %c0_i32 : i32, i32, i32
  }
  func.func @transform_2(%arg0: i32, %arg1: i32) -> (i32, i32, i32, i32) {
    %c0_i32 = arith.constant 0 : i32
    %c0_i32_0 = arith.constant 0 : i32
    %c0_i32_1 = arith.constant 0 : i32
    return %arg0, %arg1, %c0_i32, %c0_i32_0 : i32, i32, i32, i32
  }
  func.func @transform_3(%arg0: i32, %arg1: i32) -> (i32, i32) {
    %c0_i32 = arith.constant 0 : i32
    %c0_i32_0 = arith.constant 0 : i32
    %c0_i32_1 = arith.constant 0 : i32
    return %c0_i32, %c0_i32_0 : i32, i32
  }
  func.func @transform_4(%arg0: i32, %arg1: i32) -> (i32, i32) {
    %c0_i32 = arith.constant 0 : i32
    %c0_i32_0 = arith.constant 0 : i32
    %c0_i32_1 = arith.constant 0 : i32
    return %c0_i32, %c0_i32_0 : i32, i32
  }
  func.func @transform_5(%arg0: i32, %arg1: i32) -> (i32, i32) {
    %c0_i32 = arith.constant 0 : i32
    %c0_i32_0 = arith.constant 0 : i32
    %c0_i32_1 = arith.constant 0 : i32
    return %c0_i32, %c0_i32_0 : i32, i32
  }
  func.func @transform_6(%arg0: i32, %arg1: i32) -> (i32, i32) {
    %c0_i32 = arith.constant 0 : i32
    %c0_i32_0 = arith.constant 0 : i32
    %c0_i32_1 = arith.constant 0 : i32
    return %c0_i32, %c0_i32_0 : i32, i32
  }
  func.func @transform_7(%arg0: i32, %arg1: i32) -> (i32, i32) {
    %c0_i32 = arith.constant 0 : i32
    %c0_i32_0 = arith.constant 0 : i32
    %c0_i32_1 = arith.constant 0 : i32
    return %c0_i32, %c0_i32_0 : i32, i32
  }
  func.func @transform_8(%arg0: i32, %arg1: i32) -> (i32, i32) {
    %c0_i32 = arith.constant 0 : i32
    %c0_i32_0 = arith.constant 0 : i32
    %c0_i32_1 = arith.constant 0 : i32
    return %c0_i32, %c0_i32_0 : i32, i32
  }
  func.func @transform_9(%arg0: i32, %arg1: i32) -> (i32, i32, i32) {
    %c0_i32 = arith.constant 0 : i32
    %c0_i32_0 = arith.constant 0 : i32
    return %arg0, %arg1, %c0_i32 : i32, i32, i32
  }
  func.func @transform_10(%arg0: i32, %arg1: i32) -> (i32, i32, i32, i32) {
    %c0_i32 = arith.constant 0 : i32
    %c0_i32_0 = arith.constant 0 : i32
    %c0_i32_1 = arith.constant 0 : i32
    return %arg0, %arg1, %c0_i32, %c0_i32_0 : i32, i32, i32, i32
  }
}

module attributes {stable_mosaic.version = 11 : i64} {
  func.func @_apply_kernel(%arg0: i32, %arg1: i32, %arg2: memref<4x128xf32, #tpu.memory_space<vmem>>, %arg3: memref<1x16x128xf32, #tpu.memory_space<vmem>>, %arg4: memref<1x16x128xf32, #tpu.memory_space<vmem>>, %arg5: memref<1x16x16x128xf32, #tpu.memory_space<vmem>>, %arg6: memref<1x16x128xf32, #tpu.memory_space<vmem>>, %arg7: memref<128x128xf32, #tpu.memory_space<vmem>>, %arg8: memref<1x128xf32, #tpu.memory_space<vmem>>, %arg9: memref<128x128xf32, #tpu.memory_space<vmem>>, %arg10: memref<1x128xf32, #tpu.memory_space<vmem>>, %arg11: memref<1x16x16x128xf32, #tpu.memory_space<vmem>>, %arg12: memref<1x16x128xf32, #tpu.memory_space<vmem>>) attributes {dimension_semantics = [#tpu.dimension_semantics<parallel>, #tpu.dimension_semantics<parallel>], iteration_bounds = array<i64: 2, 1>, scalar_prefetch = 0 : i64, scratch_operands = 0 : i64, tpu.core_type = #tpu.core_type<tc>, window_params = [{pipeline_mode = #tpu.pipeline_mode<synchronous>, transform_indices = @transform_0, window_bounds = array<i64: 4, 128>}, {transform_indices = @transform_1, window_bounds = array<i64: 1, 16, 128>}, {transform_indices = @transform_2, window_bounds = array<i64: 1, 16, 128>}, {transform_indices = @transform_3, window_bounds = array<i64: 1, 16, 16, 128>}, {transform_indices = @transform_4, window_bounds = array<i64: 1, 16, 128>}, {pipeline_mode = #tpu.pipeline_mode<synchronous>, transform_indices = @transform_5, window_bounds = array<i64: 128, 128>}, {pipeline_mode = #tpu.pipeline_mode<synchronous>, transform_indices = @transform_6, window_bounds = array<i64: 1, 128>}, {pipeline_mode = #tpu.pipeline_mode<synchronous>, transform_indices = @transform_7, window_bounds = array<i64: 128, 128>}, {pipeline_mode = #tpu.pipeline_mode<synchronous>, transform_indices = @transform_8, window_bounds = array<i64: 1, 128>}, {transform_indices = @transform_9, window_bounds = array<i64: 1, 16, 16, 128>}, {transform_indices = @transform_10, window_bounds = array<i64: 1, 16, 128>}]} {
    %c0 = arith.constant 0 : index
    %c0_0 = arith.constant 0 : index
    %0 = vector.load %arg2[%c0, %c0_0] : memref<4x128xf32, #tpu.memory_space<vmem>>, vector<1x128xf32>
    %c1 = arith.constant 1 : index
    %c0_1 = arith.constant 0 : index
    %1 = vector.load %arg2[%c1, %c0_1] : memref<4x128xf32, #tpu.memory_space<vmem>>, vector<1x128xf32>
    %c2 = arith.constant 2 : index
    %c0_2 = arith.constant 0 : index
    %2 = vector.load %arg2[%c2, %c0_2] : memref<4x128xf32, #tpu.memory_space<vmem>>, vector<1x128xf32>
    %c3 = arith.constant 3 : index
    %c0_3 = arith.constant 0 : index
    %3 = vector.load %arg2[%c3, %c0_3] : memref<4x128xf32, #tpu.memory_space<vmem>>, vector<1x128xf32>
    %c0_4 = arith.constant 0 : index
    %c0_5 = arith.constant 0 : index
    %c0_6 = arith.constant 0 : index
    %4 = vector.load %arg3[%c0_4, %c0_5, %c0_6] : memref<1x16x128xf32, #tpu.memory_space<vmem>>, vector<1x16x128xf32>
    %5 = vector.shape_cast %4 : vector<1x16x128xf32> to vector<16x128xf32>
    %c0_7 = arith.constant 0 : index
    %c0_8 = arith.constant 0 : index
    %c0_9 = arith.constant 0 : index
    %6 = vector.load %arg4[%c0_7, %c0_8, %c0_9] : memref<1x16x128xf32, #tpu.memory_space<vmem>>, vector<1x16x128xf32>
    %7 = vector.shape_cast %6 : vector<1x16x128xf32> to vector<16x128xf32>
    %c0_10 = arith.constant 0 : index
    %c0_11 = arith.constant 0 : index
    %c0_12 = arith.constant 0 : index
    %c0_13 = arith.constant 0 : index
    %8 = vector.load %arg5[%c0_10, %c0_11, %c0_12, %c0_13] : memref<1x16x16x128xf32, #tpu.memory_space<vmem>>, vector<1x16x16x128xf32>
    %9 = vector.shape_cast %8 : vector<1x16x16x128xf32> to vector<16x16x128xf32>
    %c0_14 = arith.constant 0 : index
    %c0_15 = arith.constant 0 : index
    %10 = vector.load %arg9[%c0_14, %c0_15] : memref<128x128xf32, #tpu.memory_space<vmem>>, vector<128x128xf32>
    %cst = arith.constant dense<0.000000e+00> : vector<16x128xf32>
    %11 = tpu.matmul %5, %10, %cst {dimension_numbers = #tpu.dot_dimension_numbers<[1], [0], [0], [1], [0, 0, 1, 1], [], []>} : vector<16x128xf32>, vector<128x128xf32>, vector<16x128xf32> -> vector<16x128xf32>
    %c0_16 = arith.constant 0 : index
    %c0_17 = arith.constant 0 : index
    %12 = vector.load %arg10[%c0_16, %c0_17] : memref<1x128xf32, #tpu.memory_space<vmem>>, vector<1x128xf32>
    %13 = vector.broadcast %12 : vector<1x128xf32> to vector<16x128xf32>
    %14 = arith.addf %11, %13 : vector<16x128xf32>
    %c0_18 = arith.constant 0 : index
    %c0_19 = arith.constant 0 : index
    %15 = vector.load %arg9[%c0_18, %c0_19] : memref<128x128xf32, #tpu.memory_space<vmem>>, vector<128x128xf32>
    %cst_20 = arith.constant dense<0.000000e+00> : vector<16x128xf32>
    %16 = tpu.matmul %7, %15, %cst_20 {dimension_numbers = #tpu.dot_dimension_numbers<[1], [0], [0], [1], [0, 0, 1, 1], [], []>} : vector<16x128xf32>, vector<128x128xf32>, vector<16x128xf32> -> vector<16x128xf32>
    %c0_21 = arith.constant 0 : index
    %c0_22 = arith.constant 0 : index
    %17 = vector.load %arg10[%c0_21, %c0_22] : memref<1x128xf32, #tpu.memory_space<vmem>>, vector<1x128xf32>
    %18 = vector.broadcast %17 : vector<1x128xf32> to vector<16x128xf32>
    %19 = arith.addf %16, %18 : vector<16x128xf32>
    %20 = vector.shape_cast %9 : vector<16x16x128xf32> to vector<256x128xf32>
    %c0_23 = arith.constant 0 : index
    %c0_24 = arith.constant 0 : index
    %21 = vector.load %arg7[%c0_23, %c0_24] : memref<128x128xf32, #tpu.memory_space<vmem>>, vector<128x128xf32>
    %cst_25 = arith.constant dense<0.000000e+00> : vector<256x128xf32>
    %22 = tpu.matmul %20, %21, %cst_25 {dimension_numbers = #tpu.dot_dimension_numbers<[1], [0], [0], [1], [0, 0, 1, 1], [], []>} : vector<256x128xf32>, vector<128x128xf32>, vector<256x128xf32> -> vector<256x128xf32>
    %c0_26 = arith.constant 0 : index
    %c0_27 = arith.constant 0 : index
    %23 = vector.load %arg8[%c0_26, %c0_27] : memref<1x128xf32, #tpu.memory_space<vmem>>, vector<1x128xf32>
    %24 = vector.broadcast %23 : vector<1x128xf32> to vector<256x128xf32>
    %25 = arith.addf %22, %24 : vector<256x128xf32>
    %26 = vector.shape_cast %25 : vector<256x128xf32> to vector<16x16x128xf32>
    %27 = vector.shape_cast %14 : vector<16x128xf32> to vector<1x16x128xf32>
    %28 = vector.broadcast %27 : vector<1x16x128xf32> to vector<16x16x128xf32>
    %29 = arith.addf %26, %28 : vector<16x16x128xf32>
    %30 = vector.shape_cast %19 : vector<16x128xf32> to vector<16x1x128xf32>
    %31 = vector.broadcast %30 : vector<16x1x128xf32> to vector<16x16x128xf32>
    %32 = arith.addf %29, %31 : vector<16x16x128xf32>
    %33 = vector.shape_cast %0 : vector<1x128xf32> to vector<1x1x128xf32>
    %34 = vector.broadcast %33 : vector<1x1x128xf32> to vector<16x16x128xf32>
    %35 = arith.mulf %32, %34 : vector<16x16x128xf32>
    %36 = vector.shape_cast %1 : vector<1x128xf32> to vector<1x1x128xf32>
    %37 = vector.broadcast %36 : vector<1x1x128xf32> to vector<16x16x128xf32>
    %38 = arith.addf %35, %37 : vector<16x16x128xf32>
    %cst_28 = arith.constant 0.000000e+00 : f32
    %39 = vector.broadcast %cst_28 : f32 to vector<16x16x128xf32>
    %40 = arith.maximumf %38, %39 : vector<16x16x128xf32>
    %41 = arith.addf %9, %40 : vector<16x16x128xf32>
    %c0_29 = arith.constant 0 : index
    %c0_30 = arith.constant 0 : index
    %c0_31 = arith.constant 0 : index
    %c0_32 = arith.constant 0 : index
    %42 = vector.load %arg11[%c0_29, %c0_30, %c0_31, %c0_32] : memref<1x16x16x128xf32, #tpu.memory_space<vmem>>, vector<1x16x16x128xf32>
    %43 = vector.shape_cast %42 : vector<1x16x16x128xf32> to vector<16x16x128xf32>
    %44 = vector.shape_cast %41 : vector<16x16x128xf32> to vector<1x16x16x128xf32>
    tpu.vector_store %arg11[%c0_29, %c0_30, %c0_31, %c0_32], %44 {strides = array<i32>} : memref<1x16x16x128xf32, #tpu.memory_space<vmem>>, vector<1x16x16x128xf32>,
    %c0_33 = arith.constant 0 : index
    %c0_34 = arith.constant 0 : index
    %c0_35 = arith.constant 0 : index
    %45 = vector.load %arg6[%c0_33, %c0_34, %c0_35] : memref<1x16x128xf32, #tpu.memory_space<vmem>>, vector<1x16x128xf32>
    %46 = vector.shape_cast %45 : vector<1x16x128xf32> to vector<16x128xf32>
    %47 = vector.broadcast %2 : vector<1x128xf32> to vector<16x128xf32>
    %48 = arith.mulf %46, %47 : vector<16x128xf32>
    %49 = vector.broadcast %3 : vector<1x128xf32> to vector<16x128xf32>
    %50 = arith.addf %48, %49 : vector<16x128xf32>
    %cst_36 = arith.constant 0.000000e+00 : f32
    %51 = vector.broadcast %cst_36 : f32 to vector<16x128xf32>
    %52 = arith.maximumf %50, %51 : vector<16x128xf32>
    %53 = arith.addf %7, %52 : vector<16x128xf32>
    %c0_37 = arith.constant 0 : index
    %c0_38 = arith.constant 0 : index
    %c0_39 = arith.constant 0 : index
    %54 = vector.load %arg12[%c0_37, %c0_38, %c0_39] : memref<1x16x128xf32, #tpu.memory_space<vmem>>, vector<1x16x128xf32>
    %55 = vector.shape_cast %54 : vector<1x16x128xf32> to vector<16x128xf32>
    %56 = vector.shape_cast %53 : vector<16x128xf32> to vector<1x16x128xf32>
    tpu.vector_store %arg12[%c0_37, %c0_38, %c0_39], %56 {strides = array<i32>} : memref<1x16x128xf32, #tpu.memory_space<vmem>>, vector<1x16x128xf32>,
    return
  }
  func.func @transform_0(%arg0: i32, %arg1: i32) -> (i32, i32) {
    %c0_i32 = arith.constant 0 : i32
    %c0_i32_0 = arith.constant 0 : i32
    %c0_i32_1 = arith.constant 0 : i32
    return %c0_i32, %c0_i32_0 : i32, i32
  }
  func.func @transform_1(%arg0: i32, %arg1: i32) -> (i32, i32, i32) {
    %c0_i32 = arith.constant 0 : i32
    %c0_i32_0 = arith.constant 0 : i32
    %c0_i32_1 = arith.constant 0 : i32
    return %arg0, %c0_i32, %c0_i32_0 : i32, i32, i32
  }
  func.func @transform_2(%arg0: i32, %arg1: i32) -> (i32, i32, i32) {
    %c0_i32 = arith.constant 0 : i32
    %c0_i32_0 = arith.constant 0 : i32
    return %arg0, %arg1, %c0_i32 : i32, i32, i32
  }
  func.func @transform_3(%arg0: i32, %arg1: i32) -> (i32, i32, i32, i32) {
    %c0_i32 = arith.constant 0 : i32
    %c0_i32_0 = arith.constant 0 : i32
    %c0_i32_1 = arith.constant 0 : i32
    return %arg0, %arg1, %c0_i32, %c0_i32_0 : i32, i32, i32, i32
  }
  func.func @transform_4(%arg0: i32, %arg1: i32) -> (i32, i32, i32) {
    %c0_i32 = arith.constant 0 : i32
    %c0_i32_0 = arith.constant 0 : i32
    return %arg0, %arg1, %c0_i32 : i32, i32, i32
  }
  func.func @transform_5(%arg0: i32, %arg1: i32) -> (i32, i32) {
    %c0_i32 = arith.constant 0 : i32
    %c0_i32_0 = arith.constant 0 : i32
    %c0_i32_1 = arith.constant 0 : i32
    return %c0_i32, %c0_i32_0 : i32, i32
  }
  func.func @transform_6(%arg0: i32, %arg1: i32) -> (i32, i32) {
    %c0_i32 = arith.constant 0 : i32
    %c0_i32_0 = arith.constant 0 : i32
    %c0_i32_1 = arith.constant 0 : i32
    return %c0_i32, %c0_i32_0 : i32, i32
  }
  func.func @transform_7(%arg0: i32, %arg1: i32) -> (i32, i32) {
    %c0_i32 = arith.constant 0 : i32
    %c0_i32_0 = arith.constant 0 : i32
    %c0_i32_1 = arith.constant 0 : i32
    return %c0_i32, %c0_i32_0 : i32, i32
  }
  func.func @transform_8(%arg0: i32, %arg1: i32) -> (i32, i32) {
    %c0_i32 = arith.constant 0 : i32
    %c0_i32_0 = arith.constant 0 : i32
    %c0_i32_1 = arith.constant 0 : i32
    return %c0_i32, %c0_i32_0 : i32, i32
  }
  func.func @transform_9(%arg0: i32, %arg1: i32) -> (i32, i32, i32, i32) {
    %c0_i32 = arith.constant 0 : i32
    %c0_i32_0 = arith.constant 0 : i32
    %c0_i32_1 = arith.constant 0 : i32
    return %arg0, %arg1, %c0_i32, %c0_i32_0 : i32, i32, i32, i32
  }
  func.func @transform_10(%arg0: i32, %arg1: i32) -> (i32, i32, i32) {
    %c0_i32 = arith.constant 0 : i32
    %c0_i32_0 = arith.constant 0 : i32
    return %arg0, %arg1, %c0_i32 : i32, i32, i32
  }
}

</mosaic_0001>

<bundles_post_ra>
// kernel: residual_gated_gcn_model.5
= control target key start
LH: loop header
LB: loop body
LE: loop exit
PB: predicated region body
PF: predicated region fallthrough
CT: control target
= control target key end

     0   :  { %s2073_s13 = smov 0   ;;  %s2075_s14 = smov 0   ;;  %s2795_s0 = inlined_call_operand.vmem [shape: f32[4,128], index: 0, kind: input, shape index: {}]   ;;  %s2796_s1 = inlined_call_operand.vmem [shape: f32[2,16,128], index: 1, kind: input, shape index: {}, may-alias: {1,2}]   ;;  %s2797_s2 = inlined_call_operand.vmem [shape: f32[2,16,128], index: 2, kind: input, shape index: {}, may-alias: {1,2}]   ;;  %s2798_s3 = inlined_call_operand.vmem [shape: f32[2,16,16,128], index: 3, kind: input, shape index: {}, may-alias: {3,9}]   ;;  %s2799_s4 = inlined_call_operand.vmem [shape: f32[2,16,128], index: 4, kind: input, shape index: {}]   ;;  %s2800_s5 = inlined_call_operand.vmem [shape: f32[128,128], index: 5, kind: input, shape index: {}]   ;;  %s2801_s6 = inlined_call_operand.vmem [shape: f32[1,128], index: 6, kind: input, shape index: {}]   ;;  %s2802_s7 = inlined_call_operand.vmem [shape: f32[128,128], index: 7, kind: input, shape index: {}]   ;;  %s2803_s8 = inlined_call_operand.vmem [shape: f32[1,128], index: 8, kind: input, shape index: {}]   ;;  %s2804_s9 = inlined_call_operand.vmem [shape: f32[2,16,16,128], index: 9, kind: output, shape index: {0}, may-alias: {3,9}]   ;;  %s2805_s10 = inlined_call_operand.vmem [shape: f32[2,16,128], index: 10, kind: output, shape index: {1}]  }
   0x1   :  { %s2077_s15 = smov 0  }
   0x2 LB: > { %s33_s16 = sadd.s32 1, %s2011_s14  ;;  %p1611_p0 = scmp.ge.s32.totalorder %s2015_s15, 1  ;;  %s2015_s15 = sphi %s2077_s15, %s21_s15   ;;  %s2011_s14 = sphi %s2075_s14, %s2883_s14   ;;  %s2007_s13 = sphi %s2073_s13, %s2882_s13  }
   0x3   : > { %p35_p1 = scmp.ge.s32.totalorder %s33_s16, 2  ;;  %p383_p2 = scmp.lt.s32.totalorder %s2015_s15, 3 }
   0x5   : > { %s2885_s16 = smov (%p35_p1, %s33_s16), 0  ;;  %p384_p3 = pnand %p1611_p0, %p383_p2 }
   0x7   : > { %387 = sbr.rel (%p384_p3) target bundleno = 362 (0x16a), region = 56 }
   0xe   : > { %v560_v0 = vld [vmem:[%s2802_s7] sm:$0xff]  ;;  %v561_v1 = vld [vmem:[%s2802_s7 + $0x8] sm:$0xff]  ;;  %p463_p4 = scmp.lt.s32.totalorder %s2007_s13, 1  ;;  %v562_v5 = vld [vmem:[%s2802_s7 + $0x10] sm:$0xff] }
   0xf   : > { %v733_v2 = vld [vmem:[%s2800_s5] sm:$0xff]  ;;  %v2100_v3 = vpack.c.bf16 %v561_v1, %v560_v0  ;;  %v734_v4 = vld [vmem:[%s2800_s5 + $0x8] sm:$0xff]  ;;  %v563_v6 = vld [vmem:[%s2802_s7 + $0x18] sm:$0xff] }
  0x10   : > { %v1936_v7 = vpack.c.bf16 %v734_v4, %v733_v2  ;;  %v2111_v8 = vpack.c.bf16 %v563_v6, %v562_v5  ;;  %v735_v9 = vld [vmem:[%s2800_s5 + $0x10] sm:$0xff]  ;;  %v736_v10 = vld [vmem:[%s2800_s5 + $0x18] sm:$0xff]  ;;  %v564_v11 = vld [vmem:[%s2802_s7 + $0x20] sm:$0xff]  ;;  %s2887_s13 = smov (!%p463_p4, %s2007_s13), 1 }
  0x11   : > { %1873 = vmatprep.subr.bf16.mxu1 %v2100_v3  ;;  %v1940_v12 = vpack.c.bf16 %v736_v10, %v735_v9  ;;  %v565_v13 = vld [vmem:[%s2802_s7 + $0x28] sm:$0xff]  ;;  %v737_v14 = vld [vmem:[%s2800_s5 + $0x20] sm:$0xff]  ;;  %s2136_s25 = sshll.u32 %s2887_s13, 4  ;;  %s1634_s26 = sshll.u32 %s2887_s13, 8  ;;  %v566_v18 = vld [vmem:[%s2802_s7 + $0x30] sm:$0xff] }
  0x12   : > { %v738_v15 = vld [vmem:[%s2800_s5 + $0x28] sm:$0xff]  ;;  %1937 = vmatprep.subr.bf16.mxu0 %v1936_v7  ;;  %1875 = vmatpush3.bf16.msra.mxu1 %v2100_v3  ;;  %v2139_v16 = vpack.c.bf16 %v565_v13, %v564_v11  ;;  %v567_v19 = vld [vmem:[%s2802_s7 + $0x38] sm:$0xff]  ;;  %v739_v20 = vld [vmem:[%s2800_s5 + $0x30] sm:$0xff]  ;;  %s2158_s21 = scalar_lea.vmem %s2796_s1, %s2136_s25  ;;  %s2166_s24 = scalar_lea.vmem %s2798_s3, %s1634_s26 }
  0x13   : > { %1939 = vmatpush3.bf16.msra.mxu0 %v1936_v7  ;;  %1877 = vmatprep.subr.bf16.mxu1 %v2111_v8  ;;  %v1944_v17 = vpack.c.bf16 %v738_v15, %v737_v14  ;;  %v740_v21 = vld [vmem:[%s2800_s5 + $0x38] sm:$0xff]  ;;  %v2169_v22 = vpack.c.bf16 %v567_v19, %v566_v18  ;;  %v568_v24 = vld [vmem:[%s2802_s7 + $0x40] sm:$0xff]  ;;  %v569_v25 = vld [vmem:[%s2802_s7 + $0x48] sm:$0xff]  ;;  %s497_s22 = scalar_lea.vmem %s2799_s4, %s2136_s25  ;;  %s476_s23 = scalar_lea.vmem %s2797_s2, %s2136_s25 }
  0x14   : > { %1941 = vmatprep.subr.bf16.mxu0 %v1940_v12  ;;  %v1948_v23 = vpack.c.bf16 %v740_v21, %v739_v20  ;;  %v524_v26 = vld [vmem:[%s2158_s21] sm:$0xff]  ;;  %v742_v28 = vld [vmem:[%s2800_s5 + $0x48] sm:$0xff]  ;;  %v2194_v30 = vpack.c.bf16 %v569_v25, %v568_v24  ;;  %v570_v32 = vld [vmem:[%s2802_s7 + $0x50] sm:$0xff]  ;;  %s518_s20 = scalar_lea.vmem %s2805_s10, %s2136_s25  ;;  %s2577_s12 = scalar_lea.vmem %s2804_s9, %s1634_s26 }
  0x15   : > { %v741_v27 = vld [vmem:[%s2800_s5 + $0x40] sm:$0xff]  ;;  %1754 = vmatprep.mubr.f32.mxu1 %v524_v26  ;;  %v571_v33 = vld [vmem:[%s2802_s7 + $0x58] sm:$0xff]  ;;  %v743_v34 = vld [vmem:[%s2800_s5 + $0x50] sm:$0xff] }
  0x16   : > { %1879 = vmatpush3.bf16.msra.mxu1 %v2111_v8  ;;  %v2185_v29 = vld [vmem:[%s2166_s24] sm:$0xff]  ;;  %v1952_v31 = vpack.c.bf16 %v742_v28, %v741_v27  ;;  %v744_v35 = vld [vmem:[%s2800_s5 + $0x58] sm:$0xff]  ;;  %v1394_v36 = vld [vmem:[%s497_s22 + $0x8] sm:$0xff]  ;;  %v2210_v37 = vpack.c.bf16 %v571_v33, %v570_v32 }
  0x17   : > { %1943 = vmatpush3.bf16.msra.mxu0 %v1940_v12  ;;  %1881 = vmatprep.subr.bf16.mxu1 %v2139_v16  ;;  %v1628_v38 = vld [vmem:[%s2795_s0 + $0x2] ss:$0 sm:$0xff]  ;;  %v1629_v39 = vld [vmem:[%s2795_s0 + $0x3] ss:$0 sm:$0xff]  ;;  %v1956_v40 = vpack.c.bf16 %v744_v35, %v743_v34  ;;  %v573_v42 = vld [vmem:[%s2802_s7 + $0x68] sm:$0xff] }
  0x18   : > { %1945 = vmatprep.subr.bf16.mxu0 %v1944_v17  ;;  %1824 = vmatprep.mubr.f32.mxu0 %v2185_v29  ;;  %v572_v41 = vld [vmem:[%s2802_s7 + $0x60] sm:$0xff]  ;;  %v1400_v44 = vmul.f32 %v1628_v38, %v1394_v36  ;;  %v746_v46 = vld [vmem:[%s2800_s5 + $0x68] sm:$0xff]  ;;  %v574_v52 = vld [vmem:[%s2802_s7 + $0x70] sm:$0xff] }
  0x19   : > { %v1393_v43 = vld [vmem:[%s497_s22] sm:$0xff]  ;;  %v2236_v49 = vpack.c.bf16 %v573_v42, %v572_v41  ;;  %v575_v53 = vld [vmem:[%s2802_s7 + $0x78] sm:$0xff]  ;;  %v747_v55 = vld [vmem:[%s2800_s5 + $0x70] sm:$0xff] }
  0x1a   : > { %1883 = vmatpush3.bf16.msra.mxu1 %v2139_v16  ;;  %v745_v45 = vld [vmem:[%s2800_s5 + $0x60] sm:$0xff]  ;;  %v1399_v47 = vmul.f32 %v1628_v38, %v1393_v43  ;;  %v1406_v48 = vadd.f32 %v1629_v39, %v1400_v44  ;;  %v748_v56 = vld [vmem:[%s2800_s5 + $0x78] sm:$0xff]  ;;  %v2254_v58 = vld [vmem:[%s476_s23 + $0x8] sm:$0xff]  ;;  %v1900_v61 = vpack.c.bf16 %v575_v53, %v574_v52 }
  0x1b   : > { %1947 = vmatpush3.bf16.msra.mxu0 %v1944_v17  ;;  %1885 = vmatprep.subr.bf16.mxu1 %v2169_v22  ;;  %v1960_v51 = vpack.c.bf16 %v746_v46, %v745_v45  ;;  %v526_v59 = vld [vmem:[%s476_s23] sm:$0xff]  ;;  %v1964_v63 = vpack.c.bf16 %v748_v56, %v747_v55  ;;  %v525_v0 = vld [vmem:[%s2158_s21 + $0x8] sm:$0xff]  ;;  %v2266_v2 = vld [vmem:[%s2166_s24 + $0x10] sm:$0xff] }
  0x1c   : > { %1949 = vmatprep.subr.bf16.mxu0 %v1948_v23  ;;  %v1405_v50 = vadd.f32 %v1629_v39, %v1399_v47  ;;  %v1408_v54 = vmax.f32 %v1406_v48, 0.0  ;;  %v2263_v1 = vld [vmem:[%s2166_s24 + $0x8] sm:$0xff]  ;;  %v2273_v4 = vld [vmem:[%s2166_s24 + $0x18] sm:$0xff]  ;;  %v2276_v5 = vld [vmem:[%s2166_s24 + $0x20] sm:$0xff] }
  0x1d   : > { %v2286_v6 = vld [vmem:[%s2166_s24 + $0x30] sm:$0xff]  ;;  %v2293_v7 = vld [vmem:[%s2166_s24 + $0x38] sm:$0xff]  ;;  %v2303_v9 = vld [vmem:[%s2166_s24 + $0x48] sm:$0xff] }
  0x1e   : > { %1887 = vmatpush3.bf16.msra.mxu1 %v2169_v22  ;;  %v1407_v57 = vmax.f32 %v1405_v50, 0.0  ;;  %v1410_v60 = vadd.f32 %v1408_v54, %v2254_v58  ;;  %v2306_v10 = vld [vmem:[%s2166_s24 + $0x50] sm:$0xff]  ;;  %v2313_v11 = vld [vmem:[%s2166_s24 + $0x58] sm:$0xff]  ;;  %v2316_v12 = vld [vmem:[%s2166_s24 + $0x60] sm:$0xff] }
  0x1f   : > { %1951 = vmatpush3.bf16.msra.mxu0 %v1948_v23  ;;  %1889 = vmatprep.subr.bf16.mxu1 %v2194_v30  ;;  %v2323_v13 = vld [vmem:[%s2166_s24 + $0x68] sm:$0xff]  ;;  %v2326_v14 = vld [vmem:[%s2166_s24 + $0x70] sm:$0xff]  ;;  %v2332_v15 = vld [vmem:[%s2166_s24 + $0x78] sm:$0xff] }
  0x20   : > { %1953 = vmatprep.subr.bf16.mxu0 %v1952_v31  ;;  %v1409_v62 = vadd.f32 %v1407_v57, %v526_v59  ;;  %1412 = vst [vmem:[%s518_s20 + $0x8] sm:$0xff] %v1410_v60  ;;  %v2340_v17 = vld [vmem:[%s2166_s24 + $0x88] sm:$0xff]  ;;  %v2343_v18 = vld [vmem:[%s2166_s24 + $0x90] sm:$0xff]  ;;  %v2349_v19 = vld [vmem:[%s2166_s24 + $0x98] sm:$0xff] }
  0x21   : > { %2831 = vst [vmem:[#allocation3_spill] sm:$0xff] %v2343_v18  ;;  %2832 = vst [vmem:[#allocation4_spill] sm:$0xff] %v2349_v19  ;;  %v2352_v20 = vld [vmem:[%s2166_s24 + $0xa0] sm:$0xff]  ;;  %v2357_v21 = vld [vmem:[%s2166_s24 + $0xa8] sm:$0xff] }
  0x22   : > { %1891 = vmatpush3.bf16.msra.mxu1 %v2194_v30  ;;  %1411 = vst [vmem:[%s518_s20] sm:$0xff] %v1409_v62  ;;  %2833 = vst [vmem:[#allocation5_spill] sm:$0xff] %v2352_v20  ;;  %v2365_v23 = vld [vmem:[%s2166_s24 + $0xb8] sm:$0xff]  ;;  %v2368_v24 = vld [vmem:[%s2166_s24 + $0xc0] sm:$0xff] }
  0x23   : > { %1955 = vmatpush3.bf16.msra.mxu0 %v1952_v31  ;;  %1893 = vmatprep.subr.bf16.mxu1 %v2210_v37  ;;  %2834 = vst [vmem:[#allocation6_spill] sm:$0xff] %v2357_v21  ;;  %2836 = vst [vmem:[#allocation8_spill] sm:$0xff] %v2365_v23  ;;  %v2373_v25 = vld [vmem:[%s2166_s24 + $0xc8] sm:$0xff]  ;;  %v2376_v26 = vld [vmem:[%s2166_s24 + $0xd0] sm:$0xff] }
  0x24   : > { %1957 = vmatprep.subr.bf16.mxu0 %v1956_v40  ;;  %2837 = vst [vmem:[#allocation9_spill] sm:$0xff] %v2368_v24  ;;  %2838 = vst [vmem:[#allocation10_spill] sm:$0xff] %v2373_v25  ;;  %v2381_v27 = vld [vmem:[%s2166_s24 + $0xd8] sm:$0xff]  ;;  %v2384_v28 = vld [vmem:[%s2166_s24 + $0xe0] sm:$0xff] }
  0x25   : > { %2839 = vst [vmem:[#allocation11_spill] sm:$0xff] %v2376_v26  ;;  %2840 = vst [vmem:[#allocation12_spill] sm:$0xff] %v2381_v27  ;;  %v2392_v31 = vld [vmem:[%s2166_s24 + $0xf0] sm:$0xff]  ;;  %v2397_v32 = vld [vmem:[%s2166_s24 + $0xf8] sm:$0xff] }
  0x26   : > { %1895 = vmatpush3.bf16.msra.mxu1 %v2210_v37  ;;  %2841 = vst [vmem:[#allocation13_spill] sm:$0xff] %v2384_v28  ;;  %2843 = vst [vmem:[#allocation15_spill] sm:$0xff] %v2392_v31  ;;  %v2403_v33 = vld [vmem:[%s2803_s8] ss:$0 sm:$0xff] }
  0x27   : > { %1959 = vmatpush3.bf16.msra.mxu0 %v1956_v40  ;;  %1897 = vmatprep.subr.bf16.mxu1 %v2236_v49  ;;  %2844 = vst [vmem:[#allocation16_spill] sm:$0xff] %v2397_v32  ;;  %v2408_v34 = vld [vmem:[%s2801_s6] ss:$0 sm:$0xff] }
  0x28   : > { %1961 = vmatprep.subr.bf16.mxu0 %v1960_v51 }
  0x2a   : > { %1899 = vmatpush3.bf16.msra.mxu1 %v2236_v49 }
  0x2b   : > { %1963 = vmatpush3.bf16.msra.mxu0 %v1960_v51  ;;  %1901 = vmatprep.subr.bf16.mxu1 %v1900_v61 }
  0x2c   : > { %1965 = vmatprep.subr.bf16.mxu0 %v1964_v63 }
  0x2e   : > { %1903 = vmatpush3.bf16.msra.mxu1 %v1900_v61 }
  0x2f   : > { %1967 = vmatpush3.bf16.msra.mxu0 %v1964_v63  ;;  %1905 = vmatprep.subr.bf16.mxu1 %v2100_v3 }
  0x31   : > { %1755 = vmatmul.mubr.f32.vlgmr.msra.gmra.mrb[0].mxu1 %v525_v0 }
  0x32   : > { %1825 = vmatmul.mubr.f32.vlgmr.msra.gmra.mrb[0].mxu0 %v2263_v1  ;;  %1907 = vmatpush3.bf16.msra.mxu1 %v2100_v3  ;;  %v2283_v3 = vld [vmem:[%s2166_s24 + $0x28] sm:$0xff] }
  0x33   : > { %1827 = vmatprep.mubr.f32.mxu0 %v2266_v2  ;;  %1909 = vmatprep.subr.bf16.mxu1 %v2111_v8 }
  0x34   : > { %1789 = vmatprep.mubr.f32.mxu1 %v526_v59 }
  0x36   : > { %1828 = vmatmul.mubr.f32.gmra.mrb[2].mxu0 %v2273_v4  ;;  %1911 = vmatpush3.bf16.msra.mxu1 %v2111_v8  ;;  %v2296_v8 = vld [vmem:[%s2166_s24 + $0x40] sm:$0xff] }
  0x37   : > { %1830 = vmatprep.mubr.f32.mxu0 %v2276_v5  ;;  %1913 = vmatprep.subr.bf16.mxu1 %v2139_v16 }
  0x3a   : > { %1831 = vmatmul.mubr.f32.gmra.mrb[4].mxu0 %v2283_v3  ;;  %1915 = vmatpush3.bf16.msra.mxu1 %v2139_v16  ;;  %v2335_v16 = vld [vmem:[%s2166_s24 + $0x80] sm:$0xff] }
  0x3b   : > { %1833 = vmatprep.mubr.f32.mxu0 %v2286_v6  ;;  %1917 = vmatprep.subr.bf16.mxu1 %v2169_v22  ;;  %2830 = vst [vmem:[#allocation2_spill] sm:$0xff] %v2335_v16 }
  0x3e   : > { %1834 = vmatmul.mubr.f32.gmra.mrb[6].mxu0 %v2293_v7  ;;  %1919 = vmatpush3.bf16.msra.mxu1 %v2169_v22  ;;  %v2360_v22 = vld [vmem:[%s2166_s24 + $0xb0] sm:$0xff] }
  0x3f   : > { %1836 = vmatprep.mubr.f32.mxu0 %v2296_v8  ;;  %1921 = vmatprep.subr.bf16.mxu1 %v2194_v30  ;;  %2835 = vst [vmem:[#allocation7_spill] sm:$0xff] %v2360_v22 }
  0x42   : > { %1837 = vmatmul.mubr.f32.gmra.mrb[8].mxu0 %v2303_v9  ;;  %1923 = vmatpush3.bf16.msra.mxu1 %v2194_v30  ;;  %v2389_v30 = vld [vmem:[%s2166_s24 + $0xe8] sm:$0xff] }
  0x43   : > { %1839 = vmatprep.mubr.f32.mxu0 %v2306_v10  ;;  %1925 = vmatprep.subr.bf16.mxu1 %v2210_v37  ;;  %2842 = vst [vmem:[#allocation14_spill] sm:$0xff] %v2389_v30 }
  0x46   : > { %1840 = vmatmul.mubr.f32.gmra.mrb[10].mxu0 %v2313_v11  ;;  %1927 = vmatpush3.bf16.msra.mxu1 %v2210_v37 }
  0x47   : > { %1842 = vmatprep.mubr.f32.mxu0 %v2316_v12  ;;  %1929 = vmatprep.subr.bf16.mxu1 %v2236_v49 }
  0x4a   : > { %1843 = vmatmul.mubr.f32.gmra.mrb[12].mxu0 %v2323_v13  ;;  %1931 = vmatpush3.bf16.msra.mxu1 %v2236_v49 }
  0x4b   : > { %1845 = vmatprep.mubr.f32.mxu0 %v2326_v14  ;;  %1933 = vmatprep.subr.bf16.mxu1 %v1900_v61 }
  0x4e   : > { %1846 = vmatmul.mubr.f32.gmra.mrb[14].mxu0 %v2332_v15  ;;  %1935 = vmatpush3.bf16.msra.mxu1 %v1900_v61 }
  0x4f   : > { %1848 = vmatprep.mubr.f32.mxu0 %v2335_v16 }
  0x51   : > { %1790 = vmatmul.mubr.f32.vlgmr.msra.gmra.mrb[2].mxu1 %v2254_v58 }
  0x52   : > { %1849 = vmatmul.mubr.f32.gmra.mrb[16].mxu0 %v2340_v17 }
  0x53   : > { %1851 = vmatprep.mubr.f32.mxu0 %v2343_v18 }
  0x56   : > { %1852 = vmatmul.mubr.f32.gmra.mrb[18].mxu0 %v2349_v19 }
  0x57   : > { %1854 = vmatprep.mubr.f32.mxu0 %v2352_v20 }
  0x5a   : > { %1855 = vmatmul.mubr.f32.gmra.mrb[20].mxu0 %v2357_v21 }
  0x5b   : > { %1857 = vmatprep.mubr.f32.mxu0 %v2360_v22 }
  0x5e   : > { %1858 = vmatmul.mubr.f32.gmra.mrb[22].mxu0 %v2365_v23 }
  0x5f   : > { %1860 = vmatprep.mubr.f32.mxu0 %v2368_v24 }
  0x62   : > { %1861 = vmatmul.mubr.f32.gmra.mrb[24].mxu0 %v2373_v25 }
  0x63   : > { %1863 = vmatprep.mubr.f32.mxu0 %v2376_v26 }
  0x66   : > { %1864 = vmatmul.mubr.f32.gmra.mrb[26].mxu0 %v2381_v27 }
  0x67   : > { %1866 = vmatprep.mubr.f32.mxu0 %v2384_v28 }
  0x6a   : > { %1867 = vmatmul.mubr.f32.gmra.mrb[28].mxu0 %v2389_v30 }
  0x6b   : > { %1869 = vmatprep.mubr.f32.mxu0 %v2392_v31 }
  0x6e   : > { %1870 = vmatmul.mubr.f32.gmra.mrb[30].mxu0 %v2397_v32 }
 0x104   : > { %v1756_v35 = vpop.f32.mrb[0].mxu1 }
 0x105   : > { %v2411_v36 = vadd.f32 %v1756_v35, %v2403_v33  ;;  %v1826_v37 = vpop.f32.mrb[0].mxu0  ;;  %v649_v38 = vpop.f32.mrb[1].mxu1 }
 0x106   : > { %v828_v39 = vadd.f32 %v1826_v37, %v2408_v34  ;;  %v2415_v40 = vadd.f32 %v2403_v33, %v649_v38  ;;  %v822_v41 = vpop.f32.mrb[1].mxu0 }
 0x107   : > { %2845 = vst [vmem:[#allocation17_spill] sm:$0xff] %v2411_v36  ;;  %v823_v42 = vadd.f32 %v2408_v34, %v822_v41 }
 0x108   : > { %2846 = vst [vmem:[#allocation18_spill] sm:$0xff] %v2415_v40  ;;  %v2419_v43 = vadd.f32 %v828_v39, %v2411_v36 }
 0x109   : > { %v2422_v44 = vadd.f32 %v823_v42, %v2415_v40  ;;  %v1829_v45 = vpop.f32.mrb[2].mxu0 }
 0x10a   : > { %v838_v46 = vadd.f32 %v1829_v45, %v2408_v34  ;;  %v832_v47 = vpop.f32.mrb[3].mxu0 }
 0x10b   : > { %v833_v48 = vadd.f32 %v2408_v34, %v832_v47  ;;  %v2017_v47 = vmov 1966171168  }
 0x10c   : > { %v2427_v49 = vadd.f32 %v838_v46, %v2411_v36 }
 0x10d   : > { %v2430_v50 = vadd.f32 %v833_v48, %v2415_v40  ;;  %v1832_v51 = vpop.f32.mrb[4].mxu0  ;;  %v1017_v48 = vunpack.c.l.s4 %v2017_v47 }
 0x10e   : > { %v848_v52 = vadd.f32 %v1832_v51, %v2408_v34  ;;  %v842_v53 = vpop.f32.mrb[5].mxu0  ;;  %v1019_v51 = vlaneseq }
 0x10f   : > { %v843_v54 = vadd.f32 %v2408_v34, %v842_v53 }
 0x110   : > { %v2435_v55 = vadd.f32 %v848_v52, %v2411_v36 }
 0x111   : > { %v2438_v56 = vadd.f32 %v843_v54, %v2415_v40  ;;  %v1835_v57 = vpop.f32.mrb[6].mxu0 }
 0x112   : > { %v858_v58 = vadd.f32 %v1835_v57, %v2408_v34  ;;  %v852_v59 = vpop.f32.mrb[7].mxu0 }
 0x113   : > { %v853_v60 = vadd.f32 %v2408_v34, %v852_v59 }
 0x114   : > { %v2443_v61 = vadd.f32 %v858_v58, %v2411_v36 }
 0x115   : > { %v2446_v62 = vadd.f32 %v853_v60, %v2415_v40  ;;  %v1838_v63 = vpop.f32.mrb[8].mxu0  ;;  %v1018_v60 = vunpack.c.0.s8 %v1017_v48 }
 0x116   : > { %v868_v0 = vadd.f32 %v1838_v63, %v2408_v34  ;;  %v862_v35 = vpop.f32.mrb[9].mxu0  ;;  %v1020_v63 = vshrl.u32 %v1019_v51, 7 }
 0x117   : > { %v863_v37 = vadd.f32 %v2408_v34, %v862_v35 }
 0x118   : > { %v2451_v38 = vadd.f32 %v868_v0, %v2411_v36 }
 0x119   : > { %v2454_v39 = vadd.f32 %v863_v37, %v2415_v40  ;;  %v1841_v41 = vpop.f32.mrb[10].mxu0 }
 0x11a   : > { %v878_v42 = vadd.f32 %v1841_v41, %v2408_v34  ;;  %v872_v45 = vpop.f32.mrb[11].mxu0 }
 0x11b   : > { %v873_v46 = vadd.f32 %v2408_v34, %v872_v45 }
 0x11c   : > { %v2459_v52 = vadd.f32 %v878_v42, %v2411_v36 }
 0x11d   : > { %v2462_v53 = vadd.f32 %v873_v46, %v2415_v40  ;;  %v1844_v54 = vpop.f32.mrb[12].mxu0  ;;  %v2474_v46 = vsub.s32 %v1018_v60, %v1020_v63 }
 0x11e   : > { %v888_v57 = vadd.f32 %v1844_v54, %v2408_v34  ;;  %v882_v58 = vpop.f32.mrb[13].mxu0 }
 0x11f   : > { %v883_v59 = vadd.f32 %v2408_v34, %v882_v58  ;;  %2847 = vst [vmem:[#allocation19_spill] sm:$0xff] %v2474_v46 }
 0x120   : > { %v2467_v0 = vadd.f32 %v888_v57, %v2411_v36 }
 0x121   : > { %v2470_v35 = vadd.f32 %v883_v59, %v2415_v40  ;;  %v1847_v37 = vpop.f32.mrb[14].mxu0 }
 0x122   : > { %v898_v41 = vadd.f32 %v1847_v37, %v2408_v34  ;;  %v892_v42 = vpop.f32.mrb[15].mxu0 }
 0x123   : > { %v893_v45 = vadd.f32 %v2408_v34, %v892_v42 }
 0x124   : > { %v2477_v47 = vadd.f32 %v898_v41, %v2411_v36  ;;  %v1791_v54 = vpop.f32.mrb[2].mxu1  ;;  %v2487_v41 = vsub.s32 0, %v1020_v63 }
 0x125   : > { %v2480_v48 = vadd.f32 %v893_v45, %v2415_v40  ;;  %v730_v51 = vadd.f32 %v1791_v54, %v2403_v33  ;;  %v1850_v57 = vpop.f32.mrb[16].mxu0  ;;  %v724_v58 = vpop.f32.mrb[3].mxu1 }
 0x126   : > { %v908_v59 = vadd.f32 %v1850_v57, %v2408_v34  ;;  %v725_v37 = vadd.f32 %v2403_v33, %v724_v58  ;;  %v902_v31 = vpop.f32.mrb[17].mxu0 }
 0x127   : > { %v1064_v32 = vcombine.high %v730_v51, %v730_v51  ;;  %v1071_v60 = vrot.slane %v730_v51, %v2474_v46  ;;  %v903_v42 = vadd.f32 %v2408_v34, %v902_v31 }
 0x128   : > { %v998_v28 = vadd.f32 %v908_v59, %v2411_v36  ;;  %v1015_v45 = vcombine.high %v725_v37, %v725_v37  ;;  %v1022_v30 = vrot.slane %v725_v37, %v2474_v46 }
 0x129   : > { %v2492_v54 = vrot.slane %v1064_v32, %v2474_v46  ;;  %v1079_v26 = vcombine.high %v1071_v60, %v1071_v60  ;;  %v2495_v57 = vrot.slane %v1071_v60, %v2474_v46  ;;  %v2498_v33 = vadd.f32 %v903_v42, %v2415_v40  ;;  %v1853_v51 = vpop.f32.mrb[18].mxu0  ;;  %v2525_v32 = vld [vmem:[%s2795_s0] ss:$0 sm:$0xff] }
 0x12a   : > { %v1029_v31 = vrot.slane %v1015_v45, %v2474_v46  ;;  %v1030_v63 = vcombine.high %v1022_v30, %v1022_v30  ;;  %v1038_v58 = vrot.slane %v1022_v30, %v2474_v46  ;;  %v918_v59 = vadd.f32 %v1853_v51, %v2408_v34  ;;  %v2503_v27 = vpop.f32.mrb[19].mxu0 }
 0x12b   : > { %2848 = vst [vmem:[#allocation20_spill] sm:$0xff] %v2492_v54  ;;  %v2509_v37 = vrot.slane %v2492_v54, %v2474_v46  ;;  %v2512_v60 = vrot.slane %v1079_v26, %v2474_v46  ;;  %v2518_v30 = vrot.slane %v2495_v57, %v2487_v41 }
 0x12c   : > { %v1031_v45 = vcombine.high %v1029_v31, %v1029_v31  ;;  %v1045_v51 = vrot.slane %v1029_v31, %v2474_v46  ;;  %v1052_v24 = vrot.slane %v1030_v63, %v2474_v46  ;;  %v1060_v25 = vcombine.high %v1038_v58, %v1038_v58 }
 0x12d   : > { %2849 = vst [vmem:[#allocation21_spill] sm:$0xff] %v2509_v37  ;;  %2850 = vst [vmem:[#allocation22_spill] sm:$0xff] %v2512_v60  ;;  %v1116_v26 = vrot.slane %v1038_v58, %v2487_v41  ;;  %v2529_v22 = vadd.f32 %v918_v59, %v2411_v36  ;;  %v2533_v42 = vrot.slane %v2512_v60, %v2487_v41  ;;  %v2535_v54 = vpop.f32.mrb[20].mxu0  ;;  %v2544_v58 = vld [vmem:[%s2795_s0 + $0x1] ss:$0 sm:$0xff] }
 0x12e   : > { %v1210_v31 = vadd.f32 %v2518_v30, %v998_v28  ;;  %v1059_v63 = vrot.slane %v1031_v45, %v2474_v46  ;;  %v1061_v23 = vcombine.high %v1045_v51, %v1045_v51  ;;  %v1062_v20 = vcombine.high %v1052_v24, %v1052_v24  ;;  %v2539_v21 = vpop.f32.mrb[21].mxu0 }
 0x12f   : > { %v1120_v59 = vrot.slane %v1052_v24, %v2487_v41  ;;  %v1124_v18 = vrot.slane %v1060_v25, %v2487_v41  ;;  %v1132_v37 = vrot.slane %v1045_v51, %v2487_v41  ;;  %v1193_v19 = vadd.f32 %v1116_v26, %v2422_v44 }
 0x130   : > { %v1246_v28 = vmul.f32 %v2525_v32, %v1210_v31  ;;  %v1063_v45 = vcombine.high %v1059_v63, %v1059_v63  ;;  %v1128_v46 = vrot.slane %v1062_v20, %v2487_v41  ;;  %v1136_v16 = vrot.slane %v1059_v63, %v2487_v41 }
 0x131   : > { %v1140_v36 = vrot.slane %v1061_v23, %v2487_v41  ;;  %v1194_v40 = vadd.f32 %v1116_v26, %v2419_v43  ;;  %v1195_v60 = vadd.f32 %v1120_v59, %v2430_v50  ;;  %v1196_v24 = vadd.f32 %v1120_v59, %v2427_v49  ;;  %v2557_v25 = vpop.f32.mrb[22].mxu0 }
 0x132   : > { %v1282_v44 = vadd.f32 %v2544_v58, %v1246_v28  ;;  %v1144_v51 = vrot.slane %v1063_v45, %v2487_v41  ;;  %v1197_v31 = vadd.f32 %v1124_v18, %v2438_v56  ;;  %v1198_v20 = vadd.f32 %v1124_v18, %v2435_v55  ;;  %v2563_v63 = vpop.f32.mrb[23].mxu0 }
 0x133   : > { %v1199_v23 = vadd.f32 %v1128_v46, %v2446_v62  ;;  %v1200_v43 = vadd.f32 %v1128_v46, %v2443_v61  ;;  %v1201_v50 = vadd.f32 %v1132_v37, %v2454_v39  ;;  %v1202_v49 = vadd.f32 %v1132_v37, %v2451_v38 }
 0x134   : > { %v1314_v26 = vmax.f32 %v1282_v44, 0.0  ;;  %v1203_v59 = vadd.f32 %v1136_v16, %v2462_v53  ;;  %v1204_v28 = vadd.f32 %v1136_v16, %v2459_v52  ;;  %v1205_v45 = vadd.f32 %v1140_v36, %v2470_v35 }
 0x135   : > { %v1206_v18 = vadd.f32 %v1140_v36, %v2467_v0  ;;  %v1207_v55 = vadd.f32 %v1144_v51, %v2480_v48  ;;  %v1208_v56 = vadd.f32 %v1144_v51, %v2477_v47  ;;  %v1229_v61 = vmul.f32 %v2525_v32, %v1193_v19  ;;  %v2583_v62 = vpop.f32.mrb[24].mxu0 }
 0x136   : > { %2851 = vst [vmem:[#allocation23_spill] sm:$0xff] %v2583_v62  ;;  %v1346_v16 = vadd.f32 %v1314_v26, %v2340_v17  ;;  %v1230_v38 = vmul.f32 %v2525_v32, %v1194_v40  ;;  %v1231_v39 = vmul.f32 %v2525_v32, %v1195_v60  ;;  %v1232_v52 = vmul.f32 %v2525_v32, %v1196_v24  ;;  %v2589_v53 = vpop.f32.mrb[25].mxu0 }
 0x137   : > { %2852 = vst [vmem:[#allocation24_spill] sm:$0xff] %v2589_v53  ;;  %v1233_v36 = vmul.f32 %v2525_v32, %v1197_v31  ;;  %v1234_v0 = vmul.f32 %v2525_v32, %v1198_v20  ;;  %v1235_v35 = vmul.f32 %v2525_v32, %v1199_v23  ;;  %v1236_v19 = vmul.f32 %v2525_v32, %v1200_v43 }
 0x138   : > { %1378 = vst [vmem:[%s2577_s12 + $0x88] sm:$0xff] %v1346_v16  ;;  %v1237_v46 = vmul.f32 %v2525_v32, %v1201_v50  ;;  %v1238_v17 = vmul.f32 %v2525_v32, %v1202_v49  ;;  %v1239_v40 = vmul.f32 %v2525_v32, %v1203_v59  ;;  %v1240_v47 = vmul.f32 %v2525_v32, %v1204_v28 }
 0x139   : > { %v1241_v48 = vmul.f32 %v2525_v32, %v1205_v45  ;;  %v1242_v37 = vmul.f32 %v2525_v32, %v1206_v18  ;;  %v1243_v60 = vmul.f32 %v2525_v32, %v1207_v55  ;;  %v1244_v24 = vmul.f32 %v2525_v32, %v1208_v56  ;;  %v2604_v44 = vpop.f32.mrb[26].mxu0 }
 0x13a   : > { %2853 = vst [vmem:[#allocation25_spill] sm:$0xff] %v2604_v44  ;;  %v1265_v51 = vadd.f32 %v2544_v58, %v1229_v61  ;;  %v1266_v31 = vadd.f32 %v2544_v58, %v1230_v38  ;;  %v1267_v20 = vadd.f32 %v2544_v58, %v1231_v39  ;;  %v1268_v23 = vadd.f32 %v2544_v58, %v1232_v52  ;;  %v2610_v43 = vpop.f32.mrb[27].mxu0 }
 0x13b   : > { %2854 = vst [vmem:[#allocation26_spill] sm:$0xff] %v2610_v43  ;;  %v1269_v50 = vadd.f32 %v2544_v58, %v1233_v36  ;;  %v1270_v49 = vadd.f32 %v2544_v58, %v1234_v0  ;;  %v1271_v26 = vadd.f32 %v2544_v58, %v1235_v35  ;;  %v1272_v59 = vadd.f32 %v2544_v58, %v1236_v19 }
 0x13c   : > { %v1273_v28 = vadd.f32 %v2544_v58, %v1237_v46  ;;  %v1274_v45 = vadd.f32 %v2544_v58, %v1238_v17  ;;  %v1275_v18 = vadd.f32 %v2544_v58, %v1239_v40  ;;  %v1276_v55 = vadd.f32 %v2544_v58, %v1240_v47 }
 0x13d   : > { %v1277_v56 = vadd.f32 %v2544_v58, %v1241_v48  ;;  %v1278_v61 = vadd.f32 %v2544_v58, %v1242_v37  ;;  %v1279_v16 = vadd.f32 %v2544_v58, %v1243_v60  ;;  %v1280_v38 = vadd.f32 %v2544_v58, %v1244_v24  ;;  %v2624_v39 = vpop.f32.mrb[28].mxu0 }
 0x13e   : > { %v1297_v52 = vmax.f32 %v1265_v51, 0.0  ;;  %v1298_v36 = vmax.f32 %v1266_v31, 0.0  ;;  %v1299_v0 = vmax.f32 %v1267_v20, 0.0  ;;  %v1300_v35 = vmax.f32 %v1268_v23, 0.0  ;;  %v2626_v19 = vpop.f32.mrb[29].mxu0 }
 0x13f   : > { %v1301_v46 = vmax.f32 %v1269_v50, 0.0  ;;  %v1302_v17 = vmax.f32 %v1270_v49, 0.0  ;;  %v1303_v40 = vmax.f32 %v1271_v26, 0.0  ;;  %v1304_v47 = vmax.f32 %v1272_v59, 0.0 }
 0x140   : > { %v1305_v43 = vmax.f32 %v1273_v28, 0.0  ;;  %v1306_v48 = vmax.f32 %v1274_v45, 0.0  ;;  %v1307_v44 = vmax.f32 %v1275_v18, 0.0  ;;  %v1308_v37 = vmax.f32 %v1276_v55, 0.0 }
 0x141   : > { %v1309_v53 = vmax.f32 %v1277_v56, 0.0  ;;  %v1310_v60 = vmax.f32 %v1278_v61, 0.0  ;;  %v1311_v62 = vmax.f32 %v1279_v16, 0.0  ;;  %v1312_v24 = vmax.f32 %v1280_v38, 0.0  ;;  %v2628_v51 = vpop.f32.mrb[30].mxu0 }
 0x142   : > { %v1329_v31 = vadd.f32 %v1297_v52, %v2185_v29  ;;  %v1330_v20 = vadd.f32 %v1298_v36, %v2263_v1  ;;  %v1331_v23 = vadd.f32 %v1299_v0, %v2266_v2  ;;  %v1332_v50 = vadd.f32 %v1300_v35, %v2273_v4  ;;  %v2634_v49 = vpop.f32.mrb[31].mxu0  ;;  %v2859_v36 = vld [vmem:[#allocation23_spill] sm:$0xff] }
 0x143   : > { %v1333_v26 = vadd.f32 %v1301_v46, %v2276_v5  ;;  %v1334_v59 = vadd.f32 %v1302_v17, %v2283_v3  ;;  %v1335_v28 = vadd.f32 %v1303_v40, %v2286_v6  ;;  %v1336_v29 = vadd.f32 %v1304_v47, %v2293_v7 }
 0x144   : > { %v1337_v1 = vadd.f32 %v1305_v43, %v2296_v8  ;;  %v1338_v2 = vadd.f32 %v1306_v48, %v2303_v9  ;;  %v1339_v4 = vadd.f32 %v1307_v44, %v2306_v10  ;;  %v1340_v5 = vadd.f32 %v1308_v37, %v2313_v11  ;;  %1361 = vst [vmem:[%s2577_s12] sm:$0xff] %v1329_v31  ;;  %v2858_v44 = vld [vmem:[#allocation17_spill] sm:$0xff]  ;;  %v2860_v37 = vld [vmem:[#allocation2_spill] sm:$0xff] }
 0x145   : > { %1362 = vst [vmem:[%s2577_s12 + $0x8] sm:$0xff] %v1330_v20  ;;  %1363 = vst [vmem:[%s2577_s12 + $0x10] sm:$0xff] %v1331_v23  ;;  %v1341_v3 = vadd.f32 %v1309_v53, %v2316_v12  ;;  %v1342_v6 = vadd.f32 %v1310_v60, %v2323_v13  ;;  %v1343_v7 = vadd.f32 %v1311_v62, %v2326_v14  ;;  %v2857_v62 = vld [vmem:[#allocation18_spill] sm:$0xff] }
 0x146   : > { %1364 = vst [vmem:[%s2577_s12 + $0x18] sm:$0xff] %v1332_v50  ;;  %v1344_v8 = vadd.f32 %v1312_v24, %v2332_v15  ;;  %1365 = vst [vmem:[%s2577_s12 + $0x20] sm:$0xff] %v1333_v26  ;;  %v1209_v9 = vadd.f32 %v2518_v30, %v2498_v33  ;;  %v1212_v10 = vadd.f32 %v2533_v42, %v2529_v22  ;;  %v2856_v33 = vld [vmem:[#allocation22_spill] sm:$0xff]  ;;  %v2861_v24 = vld [vmem:[#allocation4_spill] sm:$0xff] }
 0x147   : > { %1366 = vst [vmem:[%s2577_s12 + $0x28] sm:$0xff] %v1334_v59  ;;  %1367 = vst [vmem:[%s2577_s12 + $0x30] sm:$0xff] %v1335_v28  ;;  %v913_v11 = vadd.f32 %v2408_v34, %v2503_v27  ;;  %v928_v12 = vadd.f32 %v2535_v54, %v2408_v34  ;;  %v2855_v13 = vcombine.high %v2495_v57, %v2495_v57  ;;  %v2862_v28 = vld [vmem:[#allocation21_spill] sm:$0xff] }
 0x148   : > { %1368 = vst [vmem:[%s2577_s12 + $0x38] sm:$0xff] %v1336_v29  ;;  %1369 = vst [vmem:[%s2577_s12 + $0x40] sm:$0xff] %v1337_v1  ;;  %v923_v15 = vadd.f32 %v2408_v34, %v2539_v21  ;;  %v938_v22 = vadd.f32 %v2557_v25, %v2408_v34  ;;  %v1111_v27 = vcombine.high %v2856_v33, %v2856_v33  ;;  %v2867_v33 = vld [vmem:[#allocation5_spill] sm:$0xff] }
 0x149   : > { %1370 = vst [vmem:[%s2577_s12 + $0x48] sm:$0xff] %v1338_v2  ;;  %1371 = vst [vmem:[%s2577_s12 + $0x50] sm:$0xff] %v1339_v4  ;;  %v1156_v14 = vrot.slane %v2855_v13, %v2487_v41  ;;  %v1245_v54 = vmul.f32 %v2525_v32, %v1209_v9  ;;  %v1248_v30 = vmul.f32 %v2525_v32, %v1212_v10  ;;  %v2863_v4 = vld [vmem:[#allocation24_spill] sm:$0xff]  ;;  %v2866_v13 = vld [vmem:[#allocation6_spill] sm:$0xff] }
 0x14a   : > { %1372 = vst [vmem:[%s2577_s12 + $0x58] sm:$0xff] %v1340_v5  ;;  %1373 = vst [vmem:[%s2577_s12 + $0x60] sm:$0xff] %v1341_v3  ;;  %v999_v53 = vadd.f32 %v913_v11, %v2857_v62  ;;  %v1002_v43 = vadd.f32 %v928_v12, %v2858_v44  ;;  %v1001_v57 = vadd.f32 %v923_v15, %v2857_v62  ;;  %v2864_v3 = vld [vmem:[#allocation25_spill] sm:$0xff]  ;;  %v2865_v11 = vld [vmem:[#allocation3_spill] sm:$0xff] }
 0x14b   : > { %1374 = vst [vmem:[%s2577_s12 + $0x68] sm:$0xff] %v1342_v6  ;;  %1375 = vst [vmem:[%s2577_s12 + $0x70] sm:$0xff] %v1343_v7  ;;  %v1004_v45 = vadd.f32 %v938_v22, %v2858_v44  ;;  %v1160_v21 = vrot.slane %v1111_v27, %v2487_v41  ;;  %v933_v25 = vadd.f32 %v2408_v34, %v2563_v63 }
 0x14c   : > { %1376 = vst [vmem:[%s2577_s12 + $0x78] sm:$0xff] %v1344_v8  ;;  %v1281_v18 = vadd.f32 %v2544_v58, %v1245_v54  ;;  %v1284_v55 = vadd.f32 %v2544_v58, %v1248_v30  ;;  %v1211_v56 = vadd.f32 %v2533_v42, %v999_v53  ;;  %v1214_v61 = vadd.f32 %v1156_v14, %v1002_v43  ;;  %v2868_v54 = vld [vmem:[#allocation8_spill] sm:$0xff] }
 0x14d   : > { %v1213_v16 = vadd.f32 %v1156_v14, %v1001_v57  ;;  %v1216_v38 = vadd.f32 %v1160_v21, %v1004_v45  ;;  %v1003_v52 = vadd.f32 %v933_v25, %v2857_v62  ;;  %v948_v0 = vadd.f32 %v2859_v36, %v2408_v34  ;;  %v2869_v45 = vld [vmem:[#allocation19_spill] sm:$0xff] }
 0x14e   : > { %v1313_v35 = vmax.f32 %v1281_v18, 0.0  ;;  %v1316_v46 = vmax.f32 %v1284_v55, 0.0  ;;  %v1247_v63 = vmul.f32 %v2525_v32, %v1211_v56  ;;  %v1250_v17 = vmul.f32 %v2525_v32, %v1214_v61  ;;  %v2872_v55 = vld [vmem:[#allocation26_spill] sm:$0xff] }
 0x14f   : > { %v1249_v40 = vmul.f32 %v2525_v32, %v1213_v16  ;;  %v1252_v42 = vmul.f32 %v2525_v32, %v1216_v38  ;;  %v1215_v47 = vadd.f32 %v1160_v21, %v1003_v52  ;;  %v1006_v48 = vadd.f32 %v948_v0, %v2858_v44  ;;  %v2870_v21 = vld [vmem:[#allocation20_spill] sm:$0xff]  ;;  %v2873_v16 = vld [vmem:[#allocation7_spill] sm:$0xff] }
 0x150   : > { %v1345_v60 = vadd.f32 %v1313_v35, %v2860_v37  ;;  %v1348_v31 = vadd.f32 %v1316_v46, %v2861_v24  ;;  %v1283_v20 = vadd.f32 %v2544_v58, %v1247_v63  ;;  %v1286_v23 = vadd.f32 %v2544_v58, %v1250_v17  ;;  %v2874_v24 = vld [vmem:[#allocation10_spill] sm:$0xff] }
 0x151   : > { %v1285_v50 = vadd.f32 %v2544_v58, %v1249_v40  ;;  %v1288_v26 = vadd.f32 %v2544_v58, %v1252_v42  ;;  %v1251_v59 = vmul.f32 %v2525_v32, %v1215_v47  ;;  %v1164_v29 = vrot.slane %v2862_v28, %v2487_v41 }
 0x152   : > { %1377 = vst [vmem:[%s2577_s12 + $0x80] sm:$0xff] %v1345_v60  ;;  %1380 = vst [vmem:[%s2577_s12 + $0x98] sm:$0xff] %v1348_v31  ;;  %v1315_v1 = vmax.f32 %v1283_v20, 0.0  ;;  %v1318_v2 = vmax.f32 %v1286_v23, 0.0  ;;  %v943_v5 = vadd.f32 %v2408_v34, %v2863_v4  ;;  %v958_v6 = vadd.f32 %v2864_v3, %v2408_v34  ;;  %v2875_v4 = vld [vmem:[#allocation9_spill] sm:$0xff] }
 0x153   : > { %v1317_v7 = vmax.f32 %v1285_v50, 0.0  ;;  %v1320_v8 = vmax.f32 %v1288_v26, 0.0  ;;  %v1287_v9 = vadd.f32 %v2544_v58, %v1251_v59  ;;  %v1218_v10 = vadd.f32 %v1164_v29, %v1006_v48 }
 0x154   : > { %v1347_v12 = vadd.f32 %v1315_v1, %v2865_v11  ;;  %v1350_v14 = vadd.f32 %v1318_v2, %v2866_v13  ;;  %v1005_v15 = vadd.f32 %v943_v5, %v2857_v62  ;;  %v1008_v22 = vadd.f32 %v958_v6, %v2858_v44  ;;  %v2876_v13 = vld [vmem:[#allocation12_spill] sm:$0xff] }
 0x155   : > { %v1349_v27 = vadd.f32 %v1317_v7, %v2867_v33  ;;  %v1352_v30 = vadd.f32 %v1320_v8, %v2868_v54  ;;  %v1319_v53 = vmax.f32 %v1287_v9, 0.0  ;;  %v1254_v43 = vmul.f32 %v2525_v32, %v1218_v10  ;;  %v2879_v54 = vld [vmem:[#allocation13_spill] sm:$0xff] }
 0x156   : > { %1379 = vst [vmem:[%s2577_s12 + $0x90] sm:$0xff] %v1347_v12  ;;  %1382 = vst [vmem:[%s2577_s12 + $0xa8] sm:$0xff] %v1350_v14  ;;  %v1217_v57 = vadd.f32 %v1164_v29, %v1005_v15  ;;  %v2871_v25 = vcombine.high %v2870_v21, %v2870_v21  ;;  %v953_v56 = vadd.f32 %v2408_v34, %v2872_v55  ;;  %v2877_v15 = vld [vmem:[#allocation11_spill] sm:$0xff] }
 0x157   : > { %v968_v61 = vadd.f32 %v2624_v39, %v2408_v34  ;;  %1381 = vst [vmem:[%s2577_s12 + $0xa0] sm:$0xff] %v1349_v27  ;;  %1384 = vst [vmem:[%s2577_s12 + $0xb8] sm:$0xff] %v1352_v30  ;;  %v1351_v38 = vadd.f32 %v1319_v53, %v2873_v16  ;;  %v1290_v52 = vadd.f32 %v2544_v58, %v1254_v43  ;;  %v2878_v27 = vld [vmem:[#allocation14_spill] sm:$0xff] }
 0x158   : > { %v1108_v18 = vrot.slane %v2871_v25, %v2869_v45  ;;  %v1110_v36 = vcombine.high %v2862_v28, %v2862_v28  ;;  %v963_v0 = vadd.f32 %v2408_v34, %v2626_v19  ;;  %v1253_v35 = vmul.f32 %v2525_v32, %v1217_v57  ;;  %v2880_v45 = vld [vmem:[#allocation16_spill] sm:$0xff] }
 0x159   : > { %v1007_v63 = vadd.f32 %v953_v56, %v2857_v62  ;;  %v1010_v39 = vadd.f32 %v968_v61, %v2858_v44  ;;  %1383 = vst [vmem:[%s2577_s12 + $0xb0] sm:$0xff] %v1351_v38  ;;  %v1322_v17 = vmax.f32 %v1290_v52, 0.0  ;;  %v978_v47 = vadd.f32 %v2628_v51, %v2408_v34 }
 0x15a   : > { %v1168_v46 = vrot.slane %v1108_v18, %v2487_v41  ;;  %v1172_v40 = vrot.slane %v1110_v36, %v2487_v41  ;;  %v1009_v42 = vadd.f32 %v963_v0, %v2857_v62  ;;  %v1289_v19 = vadd.f32 %v2544_v58, %v1253_v35 }
 0x15b   : > { %v1112_v60 = vcombine.high %v1108_v18, %v1108_v18  ;;  %v1354_v31 = vadd.f32 %v1322_v17, %v2874_v24  ;;  %v1012_v50 = vadd.f32 %v978_v47, %v2858_v44  ;;  %v973_v2 = vadd.f32 %v2408_v34, %v2634_v49  ;;  %v2881_v18 = vld [vmem:[#allocation15_spill] sm:$0xff] }
 0x15c   : > { %v1220_v48 = vadd.f32 %v1168_v46, %v1008_v22  ;;  %v1219_v37 = vadd.f32 %v1168_v46, %v1007_v63  ;;  %v1222_v20 = vadd.f32 %v1172_v40, %v1010_v39  ;;  %v1221_v23 = vadd.f32 %v1172_v40, %v1009_v42 }
 0x15d   : > { %v1321_v26 = vmax.f32 %v1289_v19, 0.0  ;;  %v1176_v29 = vrot.slane %v1112_v60, %v2487_v41  ;;  %1386 = vst [vmem:[%s2577_s12 + $0xc8] sm:$0xff] %v1354_v31  ;;  %v1011_v8 = vadd.f32 %v973_v2, %v2857_v62 }
 0x15e   : > { %v1256_v59 = vmul.f32 %v2525_v32, %v1220_v48  ;;  %v1255_v28 = vmul.f32 %v2525_v32, %v1219_v37  ;;  %v1258_v51 = vmul.f32 %v2525_v32, %v1222_v20  ;;  %v1257_v1 = vmul.f32 %v2525_v32, %v1221_v23 }
 0x15f   : > { %v1353_v5 = vadd.f32 %v1321_v26, %v2875_v4  ;;  %v1224_v6 = vadd.f32 %v1176_v29, %v1012_v50  ;;  %v1223_v12 = vadd.f32 %v1176_v29, %v1011_v8 }
 0x160   : > { %v1292_v44 = vadd.f32 %v2544_v58, %v1256_v59  ;;  %v1291_v3 = vadd.f32 %v2544_v58, %v1255_v28  ;;  %v1294_v7 = vadd.f32 %v2544_v58, %v1258_v51  ;;  %v1293_v41 = vadd.f32 %v2544_v58, %v1257_v1 }
 0x161   : > { %1385 = vst [vmem:[%s2577_s12 + $0xc0] sm:$0xff] %v1353_v5  ;;  %v1260_v49 = vmul.f32 %v2525_v32, %v1224_v6  ;;  %v1259_v53 = vmul.f32 %v2525_v32, %v1223_v12 }
 0x162   : > { %v1324_v9 = vmax.f32 %v1292_v44, 0.0  ;;  %v1323_v34 = vmax.f32 %v1291_v3, 0.0  ;;  %v1326_v10 = vmax.f32 %v1294_v7, 0.0  ;;  %v1325_v11 = vmax.f32 %v1293_v41, 0.0 }
 0x163   : > { %v1296_v33 = vadd.f32 %v2544_v58, %v1260_v49  ;;  %v1295_v57 = vadd.f32 %v2544_v58, %v1259_v53 }
 0x164   : > { %v1356_v14 = vadd.f32 %v1324_v9, %v2876_v13  ;;  %v1355_v22 = vadd.f32 %v1323_v34, %v2877_v15  ;;  %v1358_v62 = vadd.f32 %v1326_v10, %v2878_v27  ;;  %v1357_v30 = vadd.f32 %v1325_v11, %v2879_v54 }
 0x165   : > { %v1328_v43 = vmax.f32 %v1296_v33, 0.0  ;;  %v1327_v25 = vmax.f32 %v1295_v57, 0.0 }
 0x166   : > { %1388 = vst [vmem:[%s2577_s12 + $0xd8] sm:$0xff] %v1356_v14  ;;  %1387 = vst [vmem:[%s2577_s12 + $0xd0] sm:$0xff] %v1355_v22 }
 0x167   : > { %1390 = vst [vmem:[%s2577_s12 + $0xe8] sm:$0xff] %v1358_v62  ;;  %1389 = vst [vmem:[%s2577_s12 + $0xe0] sm:$0xff] %v1357_v30  ;;  %v1360_v21 = vadd.f32 %v1328_v43, %v2880_v45  ;;  %v1359_v55 = vadd.f32 %v1327_v25, %v2881_v18 }
 0x169   : > { %1392 = vst [vmem:[%s2577_s12 + $0xf8] sm:$0xff] %v1360_v21  ;;  %1391 = vst [vmem:[%s2577_s12 + $0xf0] sm:$0xff] %v1359_v55 }
 0x16a PF: > { %s21_s15 = sadd.s32 1, %s2015_s15   ;;  %s2882_s13 = smov %s2011_s14 }
 0x16b   : > { %p18_p5 = scmp.ge.s32.totalorder %s21_s15, 4   ;;  %s2883_s14 = smov %s2885_s16 }
 0x16d   :  { %20 = sbr.rel (!%p18_p5) target bundleno = 2 (0x2), region = 107 }

// kernel: residual_gated_gcn_model.4
= control target key start
LH: loop header
LB: loop body
LE: loop exit
PB: predicated region body
PF: predicated region fallthrough
CT: control target
= control target key end

     0   :  { %s2611_s13 = smov 0   ;;  %s2613_s14 = smov 0   ;;  %s3406_s0 = inlined_call_operand.vmem [shape: f32[2,16,128], index: 0, kind: input, shape index: {}, may-alias: {0,1}]   ;;  %s3407_s1 = inlined_call_operand.vmem [shape: f32[2,16,128], index: 1, kind: input, shape index: {}, may-alias: {0,1}]   ;;  %s3408_s2 = inlined_call_operand.vmem [shape: f32[2,16,16,128], index: 2, kind: input, shape index: {}]   ;;  %s3409_s3 = inlined_call_operand.vmem [shape: f32[128,128], index: 3, kind: input, shape index: {}]   ;;  %s3410_s4 = inlined_call_operand.vmem [shape: f32[1,128], index: 4, kind: input, shape index: {}]   ;;  %s3411_s5 = inlined_call_operand.vmem [shape: f32[128,128], index: 5, kind: input, shape index: {}]   ;;  %s3412_s6 = inlined_call_operand.vmem [shape: f32[1,128], index: 6, kind: input, shape index: {}]   ;;  %s3413_s7 = inlined_call_operand.vmem [shape: f32[128,384], index: 7, kind: input, shape index: {}]   ;;  %s3414_s8 = inlined_call_operand.vmem [shape: f32[1,384], index: 8, kind: input, shape index: {}]   ;;  %s3415_s9 = inlined_call_operand.vmem [shape: f32[2,16,128], index: 9, kind: output, shape index: {0}]   ;;  %s3416_s10 = inlined_call_operand.vmem [shape: f32[2,1,4,128], index: 10, kind: output, shape index: {1}]  }
   0x1   :  { %s2615_s15 = smov 0  }
   0x2 LB: > { %s33_s16 = sadd.s32 1, %s2548_s14  ;;  %p1963_p0 = scmp.ge.s32.totalorder %s2552_s15, 1  ;;  %s2552_s15 = sphi %s2615_s15, %s21_s15   ;;  %s2548_s14 = sphi %s2613_s14, %s3428_s14   ;;  %s2544_s13 = sphi %s2611_s13, %s3427_s13  }
   0x3   : > { %p35_p1 = scmp.ge.s32.totalorder %s33_s16, 2  ;;  %p366_p2 = scmp.lt.s32.totalorder %s2552_s15, 3 }
   0x5   : > { %s3430_s16 = smov (%p35_p1, %s33_s16), 0  ;;  %p367_p3 = pnand %p1963_p0, %p366_p2 }
   0x7   : > { %370 = sbr.rel (%p367_p3) target bundleno = 443 (0x1bb), region = 56 }
   0xe   : > { %v513_v0 = vld [vmem:[%s3411_s5] sm:$0xff]  ;;  %v514_v1 = vld [vmem:[%s3411_s5 + $0x8] sm:$0xff]  ;;  %p434_p4 = scmp.lt.s32.totalorder %s2544_s13, 1  ;;  %v515_v5 = vld [vmem:[%s3411_s5 + $0x10] sm:$0xff]  ;;  %vm1640_vm0 = vcmask 1041409   ;;  %vm1642_vm1 = vcmask 1042434  }
   0xf   : > { %v828_v2 = vld [vmem:[%s3409_s3] sm:$0xff]  ;;  %v2247_v3 = vpack.c.bf16 %v514_v1, %v513_v0  ;;  %v829_v4 = vld [vmem:[%s3409_s3 + $0x8] sm:$0xff]  ;;  %v516_v6 = vld [vmem:[%s3411_s5 + $0x18] sm:$0xff]  ;;  %vm1791_vm2 = vcmask 1040384   ;;  %vm1644_vm3 = vcmask 1043459   ;;  %vm1646_vm4 = vcmask 1044484  }
  0x10   : > { %v2343_v7 = vpack.c.bf16 %v829_v4, %v828_v2  ;;  %v2251_v8 = vpack.c.bf16 %v516_v6, %v515_v5  ;;  %v830_v9 = vld [vmem:[%s3409_s3 + $0x10] sm:$0xff]  ;;  %v831_v10 = vld [vmem:[%s3409_s3 + $0x18] sm:$0xff]  ;;  %v517_v11 = vld [vmem:[%s3411_s5 + $0x20] sm:$0xff]  ;;  %s3432_s13 = smov (!%p434_p4, %s2544_s13), 1  ;;  %vm1648_vm5 = vcmask 1045509   ;;  %vm1650_vm6 = vcmask 1046534  }
  0x11   : > { %2248 = vmatprep.subr.bf16.mxu0 %v2247_v3  ;;  %v2347_v12 = vpack.c.bf16 %v831_v10, %v830_v9  ;;  %v518_v13 = vld [vmem:[%s3411_s5 + $0x28] sm:$0xff]  ;;  %v832_v14 = vld [vmem:[%s3409_s3 + $0x20] sm:$0xff]  ;;  %s2668_s25 = sshll.u32 %s3432_s13, 4  ;;  %s2011_s26 = sshll.u32 %s3432_s13, 8  ;;  %v519_v18 = vld [vmem:[%s3411_s5 + $0x30] sm:$0xff]  ;;  %v2554_v10 = vmov 0.0  }
  0x12   : > { %v833_v15 = vld [vmem:[%s3409_s3 + $0x28] sm:$0xff]  ;;  %2344 = vmatprep.subr.bf16.mxu1 %v2343_v7  ;;  %2250 = vmatpush3.bf16.msra.mxu0 %v2247_v3  ;;  %v2255_v16 = vpack.c.bf16 %v518_v13, %v517_v11  ;;  %v520_v19 = vld [vmem:[%s3411_s5 + $0x38] sm:$0xff]  ;;  %v834_v20 = vld [vmem:[%s3409_s3 + $0x30] sm:$0xff]  ;;  %s2687_s21 = scalar_lea.vmem %s3406_s0, %s2668_s25  ;;  %s2692_s24 = scalar_lea.vmem %s3408_s2, %s2011_s26  ;;  %vm1652_vm7 = vcmask 1047559   ;;  %vm1793_vm8 = vcmask 1041408   ;;  %vm1795_vm9 = vcmask 1042432  }
  0x13   : > { %2346 = vmatpush3.bf16.msra.mxu1 %v2343_v7  ;;  %2252 = vmatprep.subr.bf16.mxu0 %v2251_v8  ;;  %v2351_v17 = vpack.c.bf16 %v833_v15, %v832_v14  ;;  %v835_v21 = vld [vmem:[%s3409_s3 + $0x38] sm:$0xff]  ;;  %v2259_v22 = vpack.c.bf16 %v520_v19, %v519_v18  ;;  %v521_v24 = vld [vmem:[%s3411_s5 + $0x40] sm:$0xff]  ;;  %v522_v25 = vld [vmem:[%s3411_s5 + $0x48] sm:$0xff]  ;;  %s447_s17 = scalar_lea.vmem %s3407_s1, %s2668_s25  ;;  %s468_s30 = scalar_lea.vmem %s3415_s9, %s2668_s25 }
  0x14   : > { %2348 = vmatprep.subr.bf16.mxu1 %v2347_v12  ;;  %v2355_v23 = vpack.c.bf16 %v835_v21, %v834_v20  ;;  %v477_v26 = vld [vmem:[%s2687_s21] sm:$0xff]  ;;  %v837_v28 = vld [vmem:[%s3409_s3 + $0x48] sm:$0xff]  ;;  %v2263_v30 = vpack.c.bf16 %v522_v25, %v521_v24  ;;  %v523_v32 = vld [vmem:[%s3411_s5 + $0x50] sm:$0xff]  ;;  %s1972_s25 = sshll.u32 %s3432_s13, 2 }
  0x15   : > { %v836_v27 = vld [vmem:[%s3409_s3 + $0x40] sm:$0xff]  ;;  %2129 = vmatprep.mubr.f32.mxu0 %v477_v26  ;;  %v524_v33 = vld [vmem:[%s3411_s5 + $0x58] sm:$0xff]  ;;  %v838_v34 = vld [vmem:[%s3409_s3 + $0x50] sm:$0xff]  ;;  %s476_s26 = scalar_lea.vmem %s3416_s10, %s1972_s25 }
  0x16   : > { %2254 = vmatpush3.bf16.msra.mxu0 %v2251_v8  ;;  %v481_v29 = vld [vmem:[%s2692_s24] sm:$0xff]  ;;  %v2359_v31 = vpack.c.bf16 %v837_v28, %v836_v27  ;;  %v839_v35 = vld [vmem:[%s3409_s3 + $0x58] sm:$0xff]  ;;  %v2267_v36 = vpack.c.bf16 %v524_v33, %v523_v32  ;;  %v526_v39 = vld [vmem:[%s3411_s5 + $0x68] sm:$0xff] }
  0x17   : > { %2350 = vmatpush3.bf16.msra.mxu1 %v2347_v12  ;;  %2256 = vmatprep.subr.bf16.mxu0 %v2255_v16  ;;  %v2363_v37 = vpack.c.bf16 %v839_v35, %v838_v34  ;;  %v525_v38 = vld [vmem:[%s3411_s5 + $0x60] sm:$0xff]  ;;  %v841_v41 = vld [vmem:[%s3409_s3 + $0x68] sm:$0xff]  ;;  %v527_v44 = vld [vmem:[%s3411_s5 + $0x70] sm:$0xff] }
  0x18   : > { %2352 = vmatprep.subr.bf16.mxu1 %v2351_v17  ;;  %2199 = vmatprep.mubr.f32.mxu1 %v481_v29  ;;  %v840_v40 = vld [vmem:[%s3409_s3 + $0x60] sm:$0xff]  ;;  %v2271_v42 = vpack.c.bf16 %v526_v39, %v525_v38  ;;  %v528_v45 = vld [vmem:[%s3411_s5 + $0x78] sm:$0xff]  ;;  %v842_v46 = vld [vmem:[%s3409_s3 + $0x70] sm:$0xff] }
  0x19   : > { %v2367_v43 = vpack.c.bf16 %v841_v41, %v840_v40  ;;  %v843_v47 = vld [vmem:[%s3409_s3 + $0x78] sm:$0xff]  ;;  %v2275_v48 = vpack.c.bf16 %v528_v45, %v527_v44  ;;  %v612_v50 = vld [vmem:[%s3413_s7 + $0x8] sm:$0xff]  ;;  %v615_v51 = vld [vmem:[%s3413_s7 + $0x20] sm:$0xff] }
  0x1a   : > { %2258 = vmatpush3.bf16.msra.mxu0 %v2255_v16  ;;  %v2371_v49 = vpack.c.bf16 %v843_v47, %v842_v46  ;;  %v2279_v52 = vpack.c.bf16 %v615_v51, %v612_v50  ;;  %v611_v53 = vld [vmem:[%s3413_s7] sm:$0xff]  ;;  %v614_v54 = vld [vmem:[%s3413_s7 + $0x18] sm:$0xff]  ;;  %v621_v56 = vld [vmem:[%s3413_s7 + $0x50] sm:$0xff] }
  0x1b   : > { %2354 = vmatpush3.bf16.msra.mxu1 %v2351_v17  ;;  %2260 = vmatprep.subr.bf16.mxu0 %v2259_v22  ;;  %v618_v55 = vld [vmem:[%s3413_s7 + $0x38] sm:$0xff]  ;;  %v478_v57 = vld [vmem:[%s2687_s21 + $0x8] sm:$0xff]  ;;  %v2281_v58 = vpack.c.bf16 %v614_v54, %v611_v53  ;;  %v617_v61 = vld [vmem:[%s3413_s7 + $0x30] sm:$0xff] }
  0x1c   : > { %2356 = vmatprep.subr.bf16.mxu1 %v2355_v23  ;;  %v482_v59 = vld [vmem:[%s2692_s24 + $0x8] sm:$0xff]  ;;  %v2283_v60 = vpack.c.bf16 %v621_v56, %v618_v55  ;;  %v483_v63 = vld [vmem:[%s2692_s24 + $0x10] sm:$0xff]  ;;  %v627_v1 = vld [vmem:[%s3413_s7 + $0x80] sm:$0xff] }
  0x1d   : > { %v620_v62 = vld [vmem:[%s3413_s7 + $0x48] sm:$0xff]  ;;  %v484_v3 = vld [vmem:[%s2692_s24 + $0x18] sm:$0xff]  ;;  %v623_v5 = vld [vmem:[%s3413_s7 + $0x60] sm:$0xff] }
  0x1e   : > { %2262 = vmatpush3.bf16.msra.mxu0 %v2259_v22  ;;  %v624_v0 = vld [vmem:[%s3413_s7 + $0x68] sm:$0xff]  ;;  %v2285_v2 = vpack.c.bf16 %v620_v62, %v617_v61  ;;  %v626_v6 = vld [vmem:[%s3413_s7 + $0x78] sm:$0xff]  ;;  %v485_v7 = vld [vmem:[%s2692_s24 + $0x20] sm:$0xff] }
  0x1f   : > { %2358 = vmatpush3.bf16.msra.mxu1 %v2355_v23  ;;  %2264 = vmatprep.subr.bf16.mxu0 %v2263_v30  ;;  %v2287_v4 = vpack.c.bf16 %v627_v1, %v624_v0  ;;  %v630_v8 = vld [vmem:[%s3413_s7 + $0x98] sm:$0xff]  ;;  %v633_v9 = vld [vmem:[%s3413_s7 + $0xb0] sm:$0xff]  ;;  %v2289_v11 = vpack.c.bf16 %v626_v6, %v623_v5  ;;  %v486_v12 = vld [vmem:[%s2692_s24 + $0x28] sm:$0xff] }
  0x20   : > { %2360 = vmatprep.subr.bf16.mxu1 %v2359_v31  ;;  %v2291_v13 = vpack.c.bf16 %v633_v9, %v630_v8  ;;  %v629_v14 = vld [vmem:[%s3413_s7 + $0x90] sm:$0xff]  ;;  %v632_v15 = vld [vmem:[%s3413_s7 + $0xa8] sm:$0xff]  ;;  %v639_v18 = vld [vmem:[%s3413_s7 + $0xe0] sm:$0xff] }
  0x21   : > { %v487_v16 = vld [vmem:[%s2692_s24 + $0x30] sm:$0xff]  ;;  %v636_v17 = vld [vmem:[%s3413_s7 + $0xc8] sm:$0xff]  ;;  %v2293_v19 = vpack.c.bf16 %v632_v15, %v629_v14  ;;  %v488_v20 = vld [vmem:[%s2692_s24 + $0x38] sm:$0xff] }
  0x22   : > { %2266 = vmatpush3.bf16.msra.mxu0 %v2263_v30  ;;  %v2295_v21 = vpack.c.bf16 %v639_v18, %v636_v17  ;;  %v635_v22 = vld [vmem:[%s3413_s7 + $0xc0] sm:$0xff]  ;;  %v638_v23 = vld [vmem:[%s3413_s7 + $0xd8] sm:$0xff]  ;;  %v645_v26 = vld [vmem:[%s3413_s7 + $0x110] sm:$0xff] }
  0x23   : > { %2362 = vmatpush3.bf16.msra.mxu1 %v2359_v31  ;;  %2268 = vmatprep.subr.bf16.mxu0 %v2267_v36  ;;  %v489_v24 = vld [vmem:[%s2692_s24 + $0x40] sm:$0xff]  ;;  %v642_v25 = vld [vmem:[%s3413_s7 + $0xf8] sm:$0xff]  ;;  %v2297_v27 = vpack.c.bf16 %v638_v23, %v635_v22  ;;  %v490_v28 = vld [vmem:[%s2692_s24 + $0x48] sm:$0xff] }
  0x24   : > { %2364 = vmatprep.subr.bf16.mxu1 %v2363_v37  ;;  %v2299_v29 = vpack.c.bf16 %v645_v26, %v642_v25  ;;  %v641_v30 = vld [vmem:[%s3413_s7 + $0xf0] sm:$0xff]  ;;  %v644_v31 = vld [vmem:[%s3413_s7 + $0x108] sm:$0xff]  ;;  %v651_v34 = vld [vmem:[%s3413_s7 + $0x140] sm:$0xff] }
  0x25   : > { %v491_v32 = vld [vmem:[%s2692_s24 + $0x50] sm:$0xff]  ;;  %v648_v33 = vld [vmem:[%s3413_s7 + $0x128] sm:$0xff]  ;;  %v2301_v35 = vpack.c.bf16 %v644_v31, %v641_v30  ;;  %v647_v38 = vld [vmem:[%s3413_s7 + $0x120] sm:$0xff] }
  0x26   : > { %2270 = vmatpush3.bf16.msra.mxu0 %v2267_v36  ;;  %v492_v36 = vld [vmem:[%s2692_s24 + $0x58] sm:$0xff]  ;;  %v493_v40 = vld [vmem:[%s2692_s24 + $0x60] sm:$0xff]  ;;  %v494_v44 = vld [vmem:[%s2692_s24 + $0x68] sm:$0xff] }
  0x27   : > { %2366 = vmatpush3.bf16.msra.mxu1 %v2363_v37  ;;  %2272 = vmatprep.subr.bf16.mxu0 %v2271_v42  ;;  %v2303_v37 = vpack.c.bf16 %v651_v34, %v648_v33  ;;  %v650_v39 = vld [vmem:[%s3413_s7 + $0x138] sm:$0xff]  ;;  %v653_v46 = vld [vmem:[%s3413_s7 + $0x150] sm:$0xff]  ;;  %v656_v47 = vld [vmem:[%s3413_s7 + $0x168] sm:$0xff] }
  0x28   : > { %2368 = vmatprep.subr.bf16.mxu1 %v2367_v43  ;;  %v654_v41 = vld [vmem:[%s3413_s7 + $0x158] sm:$0xff]  ;;  %v616_v50 = vld [vmem:[%s3413_s7 + $0x28] sm:$0xff]  ;;  %v2309_v51 = vpack.c.bf16 %v656_v47, %v653_v46  ;;  %v497_v54 = vld [vmem:[%s2692_s24 + $0x80] sm:$0xff] }
  0x29   : > { %v619_v55 = vld [vmem:[%s3413_s7 + $0x40] sm:$0xff]  ;;  %v622_v56 = vld [vmem:[%s3413_s7 + $0x58] sm:$0xff]  ;;  %v625_v61 = vld [vmem:[%s3413_s7 + $0x70] sm:$0xff] }
  0x2a   : > { %2274 = vmatpush3.bf16.msra.mxu0 %v2271_v42  ;;  %v657_v42 = vld [vmem:[%s3413_s7 + $0x170] sm:$0xff]  ;;  %v628_v62 = vld [vmem:[%s3413_s7 + $0x88] sm:$0xff]  ;;  %v500_v0 = vld [vmem:[%s2692_s24 + $0x98] sm:$0xff] }
  0x2b   : > { %2370 = vmatpush3.bf16.msra.mxu1 %v2367_v43  ;;  %2276 = vmatprep.subr.bf16.mxu0 %v2275_v48  ;;  %v2305_v43 = vpack.c.bf16 %v650_v39, %v647_v38  ;;  %v2307_v45 = vpack.c.bf16 %v657_v42, %v654_v41  ;;  %v501_v1 = vld [vmem:[%s2692_s24 + $0xa0] sm:$0xff]  ;;  %v502_v5 = vld [vmem:[%s2692_s24 + $0xa8] sm:$0xff]  ;;  %v503_v6 = vld [vmem:[%s2692_s24 + $0xb0] sm:$0xff] }
  0x2c   : > { %2372 = vmatprep.subr.bf16.mxu1 %v2371_v49  ;;  %v637_v8 = vld [vmem:[%s3413_s7 + $0xd0] sm:$0xff]  ;;  %v640_v9 = vld [vmem:[%s3413_s7 + $0xe8] sm:$0xff]  ;;  %v646_v14 = vld [vmem:[%s3413_s7 + $0x118] sm:$0xff] }
  0x2d   : > { %v506_v15 = vld [vmem:[%s2692_s24 + $0xc8] sm:$0xff]  ;;  %v649_v18 = vld [vmem:[%s3413_s7 + $0x130] sm:$0xff]  ;;  %v655_v23 = vld [vmem:[%s3413_s7 + $0x160] sm:$0xff] }
  0x2e   : > { %2278 = vmatpush3.bf16.msra.mxu0 %v2275_v48  ;;  %v495_v48 = vld [vmem:[%s2692_s24 + $0x70] sm:$0xff]  ;;  %v510_v25 = vld [vmem:[%s2692_s24 + $0xe8] sm:$0xff]  ;;  %v1973_v34 = vld [vmem:[%s3412_s6] ss:$0 sm:$0xff] }
  0x2f   : > { %2374 = vmatpush3.bf16.msra.mxu1 %v2371_v49  ;;  %2280 = vmatprep.subr.bf16.mxu0 %v2279_v52  ;;  %v613_v49 = vld [vmem:[%s3413_s7 + $0x10] sm:$0xff]  ;;  %v496_v52 = vld [vmem:[%s2692_s24 + $0x78] sm:$0xff] }
  0x30   : > { %v2311_v53 = vpack.c.bf16 %v616_v50, %v613_v49  ;;  %v511_v26 = vld [vmem:[%s2692_s24 + $0xf0] sm:$0xff] }
  0x31   : > { %2130 = vmatmul.mubr.f32.vlgmr.msra.gmra.mrb[0].mxu0 %v478_v57  ;;  %v479_v57 = vld [vmem:[%s447_s17] sm:$0xff] }
  0x32   : > { %2200 = vmatmul.mubr.f32.vlgmr.msra.gmra.mrb[0].mxu1 %v482_v59  ;;  %2282 = vmatpush1.bf16.msra.mxu0 %v2281_v58  ;;  %v498_v58 = vld [vmem:[%s2692_s24 + $0x88] sm:$0xff]  ;;  %v499_v59 = vld [vmem:[%s2692_s24 + $0x90] sm:$0xff] }
  0x33   : > { %2202 = vmatprep.mubr.f32.mxu1 %v483_v63  ;;  %2284 = vmatprep.subr.bf16.mxu0 %v2283_v60  ;;  %v2315_v60 = vpack.c.bf16 %v622_v56, %v619_v55  ;;  %v480_v63 = vld [vmem:[%s447_s17 + $0x8] sm:$0xff] }
  0x34   : > { %740 = vmatprep.mubr.f32.mxu0 %v2554_v10 }
  0x36   : > { %2203 = vmatmul.mubr.f32.gmra.mrb[2].mxu1 %v484_v3  ;;  %2286 = vmatpush1.bf16.msra.mxu0 %v2285_v2  ;;  %v2319_v2 = vpack.c.bf16 %v628_v62, %v625_v61  ;;  %v631_v3 = vld [vmem:[%s3413_s7 + $0xa0] sm:$0xff] }
  0x37   : > { %2205 = vmatprep.mubr.f32.mxu1 %v485_v7  ;;  %2288 = vmatprep.subr.bf16.mxu0 %v2287_v4  ;;  %v634_v4 = vld [vmem:[%s3413_s7 + $0xb8] sm:$0xff] }
  0x38   : > { %v2323_v7 = vpack.c.bf16 %v634_v4, %v631_v3 }
  0x3a   : > { %2206 = vmatmul.mubr.f32.gmra.mrb[4].mxu1 %v486_v12  ;;  %2290 = vmatpush1.bf16.msra.mxu0 %v2289_v11  ;;  %v505_v11 = vld [vmem:[%s2692_s24 + $0xc0] sm:$0xff]  ;;  %v2327_v12 = vpack.c.bf16 %v640_v9, %v637_v8 }
  0x3b   : > { %2208 = vmatprep.mubr.f32.mxu1 %v487_v16  ;;  %2292 = vmatprep.subr.bf16.mxu0 %v2291_v13  ;;  %v643_v13 = vld [vmem:[%s3413_s7 + $0x100] sm:$0xff]  ;;  %v507_v16 = vld [vmem:[%s2692_s24 + $0xd0] sm:$0xff] }
  0x3c   : > { %v2331_v17 = vpack.c.bf16 %v646_v14, %v643_v13 }
  0x3e   : > { %2209 = vmatmul.mubr.f32.gmra.mrb[6].mxu1 %v488_v20  ;;  %2294 = vmatpush1.bf16.msra.mxu0 %v2293_v19  ;;  %v652_v19 = vld [vmem:[%s3413_s7 + $0x148] sm:$0xff]  ;;  %v508_v20 = vld [vmem:[%s2692_s24 + $0xd8] sm:$0xff] }
  0x3f   : > { %2211 = vmatprep.mubr.f32.mxu1 %v489_v24  ;;  %2296 = vmatprep.subr.bf16.mxu0 %v2295_v21  ;;  %v509_v21 = vld [vmem:[%s2692_s24 + $0xe0] sm:$0xff]  ;;  %v2335_v22 = vpack.c.bf16 %v652_v19, %v649_v18  ;;  %v658_v24 = vld [vmem:[%s3413_s7 + $0x178] sm:$0xff] }
  0x42   : > { %2212 = vmatmul.mubr.f32.gmra.mrb[8].mxu1 %v490_v28  ;;  %2298 = vmatpush1.bf16.msra.mxu0 %v2297_v27  ;;  %v2339_v27 = vpack.c.bf16 %v658_v24, %v655_v23  ;;  %v512_v28 = vld [vmem:[%s2692_s24 + $0xf8] sm:$0xff] }
  0x43   : > { %2214 = vmatprep.mubr.f32.mxu1 %v491_v32  ;;  %2300 = vmatprep.subr.bf16.mxu0 %v2299_v29  ;;  %v661_v29 = vlaneseq  ;;  %v659_v32 = vld [vmem:[%s3414_s8] sm:$0x7] }
  0x45   : > { %v2926_v30 = vshrl.u32 %v661_v29, 7 }
  0x46   : > { %2215 = vmatmul.mubr.f32.gmra.mrb[10].mxu1 %v492_v36  ;;  %2302 = vmatpush1.bf16.msra.mxu0 %v2301_v35  ;;  %v2940_v35 = vld [vmem:[%s3410_s4] ss:$0 sm:$0xff] }
  0x47   : > { %2217 = vmatprep.mubr.f32.mxu1 %v493_v40  ;;  %2304 = vmatprep.subr.bf16.mxu0 %v2303_v37  ;;  %3418 = vst [vmem:[#allocation2_spill] sm:$0xff] %v2926_v30  ;;  %v667_v31 = vsub.s32 1, %v2926_v30 }
  0x49   : > { %v2932_v33 = vrot.slane %v659_v32, %v667_v31 }
  0x4a   : > { %2218 = vmatmul.mubr.f32.gmra.mrb[12].mxu1 %v494_v44  ;;  %2306 = vmatpush1.bf16.msra.mxu0 %v2305_v43 }
  0x4b   : > { %2220 = vmatprep.mubr.f32.mxu1 %v495_v48  ;;  %2308 = vmatprep.subr.bf16.mxu0 %v2307_v45 }
  0x4e   : > { %2221 = vmatmul.mubr.f32.gmra.mrb[14].mxu1 %v496_v52  ;;  %2310 = vmatpush1.bf16.msra.mxu0 %v2309_v51 }
  0x4f   : > { %2223 = vmatprep.mubr.f32.mxu1 %v497_v54  ;;  %2312 = vmatprep.subr.bf16.mxu0 %v2311_v53 }
  0x51   : > { %741 = vmatmul.mubr.f32.vlgmr.msra.gmra.mrb[2].mxu0 %v479_v57 }
  0x52   : > { %2224 = vmatmul.mubr.f32.gmra.mrb[16].mxu1 %v498_v58  ;;  %746 = vmatprep.mubr.f32.mxu0 %v2554_v10  ;;  %v504_v10 = vld [vmem:[%s2692_s24 + $0xb8] sm:$0xff] }
  0x53   : > { %2226 = vmatprep.mubr.f32.mxu1 %v499_v59  ;;  %2314 = vmatpush3.bf16.msra.mxu0 %v2311_v53 }
  0x54   : > { %2316 = vmatprep.subr.bf16.mxu0 %v2315_v60 }
  0x55   : > { %747 = vmatmul.mubr.f32.gmra.mrb[4].mxu0 %v480_v63 }
  0x56   : > { %2227 = vmatmul.mubr.f32.gmra.mrb[18].mxu1 %v500_v0  ;;  %2164 = vmatprep.mubr.f32.mxu0 %v479_v57 }
  0x57   : > { %2229 = vmatprep.mubr.f32.mxu1 %v501_v1  ;;  %2318 = vmatpush3.bf16.msra.mxu0 %v2315_v60 }
  0x58   : > { %2320 = vmatprep.subr.bf16.mxu0 %v2319_v2 }
  0x5a   : > { %2230 = vmatmul.mubr.f32.gmra.mrb[20].mxu1 %v502_v5 }
  0x5b   : > { %2232 = vmatprep.mubr.f32.mxu1 %v503_v6  ;;  %2322 = vmatpush3.bf16.msra.mxu0 %v2319_v2 }
  0x5c   : > { %2324 = vmatprep.subr.bf16.mxu0 %v2323_v7 }
  0x5e   : > { %2233 = vmatmul.mubr.f32.gmra.mrb[22].mxu1 %v504_v10  ;;  %v2555_v10 = vmov 1966171168  }
  0x5f   : > { %2235 = vmatprep.mubr.f32.mxu1 %v505_v11  ;;  %2326 = vmatpush3.bf16.msra.mxu0 %v2323_v7  ;;  %v1112_v11 = vunpack.c.l.s4 %v2555_v10 }
  0x60   : > { %2328 = vmatprep.subr.bf16.mxu0 %v2327_v12 }
  0x61   : > { %v1113_v19 = vunpack.c.0.s8 %v1112_v11 }
  0x62   : > { %2236 = vmatmul.mubr.f32.gmra.mrb[24].mxu1 %v506_v15  ;;  %v2995_v15 = vsub.s32 0, %v2926_v30 }
  0x63   : > { %2238 = vmatprep.mubr.f32.mxu1 %v507_v16  ;;  %2330 = vmatpush3.bf16.msra.mxu0 %v2327_v12 }
  0x64   : > { %2332 = vmatprep.subr.bf16.mxu0 %v2331_v17  ;;  %v664_v23 = vrot.slane %v659_v32, %v2995_v15 }
  0x66   : > { %2239 = vmatmul.mubr.f32.gmra.mrb[26].mxu1 %v508_v20 }
  0x67   : > { %2241 = vmatprep.mubr.f32.mxu1 %v509_v21  ;;  %2334 = vmatpush3.bf16.msra.mxu0 %v2331_v17 }
  0x68   : > { %2336 = vmatprep.subr.bf16.mxu0 %v2335_v22 }
  0x6a   : > { %2242 = vmatmul.mubr.f32.gmra.mrb[28].mxu1 %v510_v25 }
  0x6b   : > { %2244 = vmatprep.mubr.f32.mxu1 %v511_v26  ;;  %2338 = vmatpush3.bf16.msra.mxu0 %v2335_v22 }
  0x6c   : > { %2340 = vmatprep.subr.bf16.mxu0 %v2339_v27 }
  0x6e   : > { %2245 = vmatmul.mubr.f32.gmra.mrb[30].mxu1 %v512_v28 }
  0x6f   : > { %2342 = vmatpush3.bf16.msra.mxu0 %v2339_v27  ;;  %v3009_v27 = vsub.s32 %v1113_v19, %v2926_v30 }
  0x72   : > { %2165 = vmatmul.mubr.f32.vlgmr.msra.gmra.mrb[6].mxu0 %v480_v63 }
 0x104   : > { %v2131_v36 = vpop.f32.mrb[0].mxu0 }
 0x105   : > { %v2942_v37 = vadd.f32 %v2131_v36, %v1973_v34  ;;  %v2201_v38 = vpop.f32.mrb[0].mxu1  ;;  %v602_v39 = vpop.f32.mrb[1].mxu0 }
 0x106   : > { %v923_v40 = vadd.f32 %v2201_v38, %v2940_v35  ;;  %v2945_v41 = vadd.f32 %v1973_v34, %v602_v39  ;;  %v917_v42 = vpop.f32.mrb[1].mxu1 }
 0x107   : > { %v918_v43 = vadd.f32 %v2940_v35, %v917_v42 }
 0x108   : > { %v2949_v44 = vadd.f32 %v923_v40, %v2942_v37 }
 0x109   : > { %v2952_v45 = vadd.f32 %v918_v43, %v2945_v41  ;;  %v2204_v46 = vpop.f32.mrb[2].mxu1 }
 0x10a   : > { %v933_v47 = vadd.f32 %v2204_v46, %v2940_v35  ;;  %v927_v48 = vpop.f32.mrb[3].mxu1 }
 0x10b   : > { %v928_v49 = vadd.f32 %v2940_v35, %v927_v48 }
 0x10c   : > { %v2957_v50 = vadd.f32 %v933_v47, %v2942_v37 }
 0x10d   : > { %v2960_v51 = vadd.f32 %v928_v49, %v2945_v41  ;;  %v2207_v52 = vpop.f32.mrb[4].mxu1 }
 0x10e   : > { %v943_v53 = vadd.f32 %v2207_v52, %v2940_v35  ;;  %v937_v54 = vpop.f32.mrb[5].mxu1 }
 0x10f   : > { %v938_v55 = vadd.f32 %v2940_v35, %v937_v54 }
 0x110   : > { %v2965_v56 = vadd.f32 %v943_v53, %v2942_v37 }
 0x111   : > { %v2968_v57 = vadd.f32 %v938_v55, %v2945_v41  ;;  %v2210_v58 = vpop.f32.mrb[6].mxu1 }
 0x112   : > { %v953_v59 = vadd.f32 %v2210_v58, %v2940_v35  ;;  %v947_v60 = vpop.f32.mrb[7].mxu1 }
 0x113   : > { %v948_v61 = vadd.f32 %v2940_v35, %v947_v60 }
 0x114   : > { %v2973_v62 = vadd.f32 %v953_v59, %v2942_v37 }
 0x115   : > { %v2976_v63 = vadd.f32 %v948_v61, %v2945_v41  ;;  %v2213_v0 = vpop.f32.mrb[8].mxu1 }
 0x116   : > { %v963_v1 = vadd.f32 %v2213_v0, %v2940_v35  ;;  %v957_v2 = vpop.f32.mrb[9].mxu1 }
 0x117   : > { %v958_v3 = vadd.f32 %v2940_v35, %v957_v2 }
 0x118   : > { %v2981_v4 = vadd.f32 %v963_v1, %v2942_v37 }
 0x119   : > { %v2984_v5 = vadd.f32 %v958_v3, %v2945_v41  ;;  %v2216_v6 = vpop.f32.mrb[10].mxu1 }
 0x11a   : > { %v973_v7 = vadd.f32 %v2216_v6, %v2940_v35  ;;  %v967_v8 = vpop.f32.mrb[11].mxu1 }
 0x11b   : > { %v968_v9 = vadd.f32 %v2940_v35, %v967_v8 }
 0x11c   : > { %v2989_v12 = vadd.f32 %v973_v7, %v2942_v37 }
 0x11d   : > { %v2992_v13 = vadd.f32 %v968_v9, %v2945_v41  ;;  %v2219_v14 = vpop.f32.mrb[12].mxu1 }
 0x11e   : > { %v983_v16 = vadd.f32 %v2219_v14, %v2940_v35  ;;  %v977_v17 = vpop.f32.mrb[13].mxu1 }
 0x11f   : > { %v978_v18 = vadd.f32 %v2940_v35, %v977_v17 }
 0x120   : > { %v3000_v20 = vadd.f32 %v983_v16, %v2942_v37 }
 0x121   : > { %v3003_v21 = vadd.f32 %v978_v18, %v2945_v41  ;;  %v2222_v22 = vpop.f32.mrb[14].mxu1 }
 0x122   : > { %v993_v24 = vadd.f32 %v2222_v22, %v2940_v35  ;;  %v987_v25 = vpop.f32.mrb[15].mxu1 }
 0x123   : > { %v988_v26 = vadd.f32 %v2940_v35, %v987_v25 }
 0x124   : > { %v1091_v28 = vadd.f32 %v993_v24, %v2942_v37  ;;  %v742_v29 = vpop.f32.mrb[2].mxu0 }
 0x125   : > { %v1090_v31 = vadd.f32 %v988_v26, %v2945_v41  ;;  %v743_v34 = vadd.f32 %v742_v29, %v664_v23  ;;  %v2225_v36 = vpop.f32.mrb[16].mxu1  ;;  %v744_v38 = vpop.f32.mrb[3].mxu0 }
 0x126   : > { %v1003_v39 = vadd.f32 %v2225_v36, %v2940_v35  ;;  %v997_v40 = vpop.f32.mrb[17].mxu1  ;;  %v3015_v32 = vadd.f32 %v744_v38, %v2932_v33 }
 0x127   : > { %v1110_v42 = vcombine.high %v743_v34, %v743_v34  ;;  %v1117_v43 = vrot.slane %v743_v34, %v3009_v27  ;;  %v998_v46 = vadd.f32 %v2940_v35, %v997_v40 }
 0x128   : > { %3419 = vst [vmem:[#allocation3_spill] sm:$0xff] %v3015_v32  ;;  %v3020_v47 = vadd.f32 %v1003_v39, %v2942_v37  ;;  %v748_v48 = vpop.f32.mrb[4].mxu0 }
 0x129   : > { %v1124_v49 = vrot.slane %v1110_v42, %v3009_v27  ;;  %v1125_v52 = vcombine.high %v1117_v43, %v1117_v43  ;;  %v1133_v53 = vrot.slane %v1117_v43, %v3009_v27  ;;  %v3025_v54 = vadd.f32 %v998_v46, %v2945_v41  ;;  %v2228_v55 = vpop.f32.mrb[18].mxu1  ;;  %v750_v58 = vpop.f32.mrb[5].mxu0 }
 0x12a   : > { %v3027_v59 = vadd.f32 %v748_v48, %v664_v23  ;;  %v1013_v60 = vadd.f32 %v2228_v55, %v2940_v35  ;;  %v3030_v61 = vpop.f32.mrb[19].mxu1  ;;  %v3033_v0 = vadd.f32 %v750_v58, %v2932_v33 }
 0x12b   : > { %v1126_v1 = vcombine.high %v1124_v49, %v1124_v49  ;;  %v1140_v2 = vrot.slane %v1124_v49, %v3009_v27  ;;  %v1147_v3 = vrot.slane %v1125_v52, %v3009_v27  ;;  %v1155_v6 = vcombine.high %v1133_v53, %v1133_v53 }
 0x12c   : > { %3420 = vst [vmem:[#allocation4_spill] sm:$0xff] %v3033_v0  ;;  %v1211_v7 = vrot.slane %v1133_v53, %v2995_v15  ;;  %v1159_v8 = vcombine.high %v3027_v59, %v3027_v59  ;;  %v3041_v9 = vadd.f32 %v1013_v60, %v2942_v37 }
 0x12d   : > { %v1154_v11 = vrot.slane %v1126_v1, %v3009_v27  ;;  %v1156_v33 = vcombine.high %v1140_v2, %v1140_v2  ;;  %v1157_v14 = vcombine.high %v1147_v3, %v1147_v3  ;;  %v1215_v16 = vrot.slane %v1147_v3, %v2995_v15  ;;  %v3046_v17 = vpop.f32.mrb[20].mxu1 }
 0x12e   : > { %v1219_v18 = vrot.slane %v1155_v6, %v2995_v15  ;;  %v1227_v19 = vrot.slane %v1140_v2, %v2995_v15  ;;  %v1288_v22 = vadd.f32 %v1211_v7, %v2952_v45  ;;  %v1289_v23 = vadd.f32 %v1211_v7, %v2949_v44  ;;  %v3052_v24 = vpop.f32.mrb[21].mxu1 }
 0x12f   : > { %v1158_v25 = vcombine.high %v1154_v11, %v1154_v11  ;;  %v1223_v26 = vrot.slane %v1157_v14, %v2995_v15  ;;  %v1231_v29 = vrot.slane %v1154_v11, %v2995_v15  ;;  %v1235_v34 = vrot.slane %v1156_v33, %v2995_v15 }
 0x130   : > { %v1290_v36 = vadd.f32 %v1215_v16, %v2960_v51  ;;  %v1291_v38 = vadd.f32 %v1215_v16, %v2957_v50  ;;  %v1292_v39 = vadd.f32 %v1219_v18, %v2968_v57  ;;  %v3061_v40 = vadd.f32 %v1219_v18, %v2965_v56 }
 0x131   : > { %v1239_v44 = vrot.slane %v1158_v25, %v2995_v15  ;;  %v3065_v45 = vadd.f32 %v1223_v26, %v2976_v63  ;;  %v3068_v42 = vadd.f32 %v1223_v26, %v2973_v62  ;;  %v3071_v43 = vadd.f32 %v1227_v19, %v2984_v5  ;;  %v3073_v46 = vpop.f32.mrb[22].mxu1 }
 0x132   : > { %v3076_v50 = vadd.f32 %v1227_v19, %v2981_v4  ;;  %v3079_v51 = vadd.f32 %v1231_v29, %v2992_v13  ;;  %v3082_v56 = vadd.f32 %v1231_v29, %v2989_v12  ;;  %v3085_v57 = vadd.f32 %v1235_v34, %v3003_v21  ;;  %v3087_v63 = vpop.f32.mrb[23].mxu1 }
 0x133   : > { %v3090_v62 = vadd.f32 %v1235_v34, %v3000_v20  ;;  %v3092_v5 = vadd.f32 %v1239_v44, %v1090_v31  ;;  %v3094_v48 = vadd.f32 %v1239_v44, %v1091_v28  ;;  %v1975_v4 = vmul.f32 -1.442695, %v1288_v22 }
 0x134   : > { %v1976_v49 = vmul.f32 -1.442695, %v1289_v23  ;;  %v1977_v52 = vmul.f32 -1.442695, %v1290_v36  ;;  %v1978_v13 = vmul.f32 -1.442695, %v1291_v38  ;;  %v1669_v53 = vadd.f32 %v1289_v23, %v1288_v22 }
 0x135   : > { %2401 = vpow2.f32 %v1975_v4  ;;  %v1979_v12 = vmul.f32 -1.442695, %v1292_v39  ;;  %v1980_v55 = vmul.f32 -1.442695, %v3061_v40  ;;  %v3099_v21 = vrot.slane %v3027_v59, %v3009_v27  ;;  %v3111_v14 = vpop.f32.mrb[24].mxu1 }
 0x136   : > { %2403 = vpow2.f32 %v1976_v49  ;;  %v1981_v20 = vmul.f32 -1.442695, %v3065_v45  ;;  %v1982_v31 = vmul.f32 -1.442695, %v3068_v42  ;;  %v1983_v28 = vmul.f32 -1.442695, %v3071_v43 }
 0x137   : > { %2405 = vpow2.f32 %v1977_v52  ;;  %v1984_v58 = vmul.f32 -1.442695, %v3076_v50  ;;  %v1985_v60 = vmul.f32 -1.442695, %v3079_v51  ;;  %v1986_v1 = vmul.f32 -1.442695, %v3082_v56 }
 0x138   : > { %2407 = vpow2.f32 %v1978_v13  ;;  %v1987_v2 = vmul.f32 -1.442695, %v3085_v57  ;;  %v1988_v3 = vmul.f32 -1.442695, %v3090_v62  ;;  %v1989_v6 = vmul.f32 -1.442695, %v3092_v5 }
 0x139   : > { %2409 = vpow2.f32 %v1979_v12  ;;  %v1990_v7 = vmul.f32 -1.442695, %v3094_v48  ;;  %v1670_v11 = vadd.f32 %v1669_v53, %v1290_v36  ;;  %v1706_v33 = vmul.f32 %v1288_v22, %v1288_v22  ;;  %v3113_v25 = vpop.f32.mrb[25].mxu1 }
 0x13a   : > { %2411 = vpow2.f32 %v1980_v55  ;;  %v1707_v16 = vmul.f32 %v1289_v23, %v1289_v23  ;;  %v1708_v18 = vmul.f32 %v1290_v36, %v1290_v36  ;;  %v1709_v19 = vmul.f32 %v1291_v38, %v1291_v38  ;;  %v3119_v44 = vpop.f32.mrb[26].mxu1 }
 0x13b   : > { %2413 = vpow2.f32 %v1981_v20  ;;  %v1671_v26 = vadd.f32 %v1670_v11, %v1291_v38  ;;  %v1710_v29 = vmul.f32 %v1292_v39, %v1292_v39  ;;  %v3117_v34 = vmul.f32 %v3061_v40, %v3061_v40  ;;  %v3133_v38 = vpop.f32.mrb[27].mxu1 }
 0x13c   : > { %2415 = vpow2.f32 %v1982_v31  ;;  %v3123_v22 = vmul.f32 %v3065_v45, %v3065_v45  ;;  %v3127_v23 = vmul.f32 %v3068_v42, %v3068_v42  ;;  %v3131_v36 = vmul.f32 %v3071_v43, %v3071_v43 }
 0x13d   : > { %2417 = vpow2.f32 %v1983_v28  ;;  %v1672_v4 = vadd.f32 %v1671_v26, %v1292_v39  ;;  %v3137_v49 = vmul.f32 %v3076_v50, %v3076_v50  ;;  %v3141_v52 = vmul.f32 %v3079_v51, %v3079_v51  ;;  %v3143_v13 = vpop.f32.mrb[28].mxu1 }
 0x13e   : > { %2419 = vpow2.f32 %v1984_v58  ;;  %v3147_v53 = vmul.f32 %v3082_v56, %v3082_v56  ;;  %v3151_v12 = vmul.f32 %v3085_v57, %v3085_v57  ;;  %v3155_v39 = vmul.f32 %v3090_v62, %v3090_v62  ;;  %v3157_v55 = vpop.f32.mrb[29].mxu1 }
 0x13f   : > { %v2402_v20 = vpop.eup %2401  ;;  %2421 = vpow2.f32 %v1985_v60  ;;  %v1673_v31 = vadd.f32 %v1672_v4, %v3061_v40  ;;  %v1738_v28 = vadd.f32 %v1707_v16, %v1706_v33  ;;  %v3164_v58 = vrot.slane %v1159_v8, %v3009_v27 }
 0x140   : > { %v2404_v11 = vpop.eup %2403  ;;  %2423 = vpow2.f32 %v1986_v1  ;;  %v1416_v26 = vadd.f32 1.0, %v2402_v20  ;;  %v3168_v10 = vmul.f32 %v3092_v5, %v3092_v5  ;;  %v1174_v32 = vcombine.high %v3099_v21, %v3099_v21 }
 0x141   : > { %v2406_v60 = vpop.eup %2405  ;;  %2425 = vpow2.f32 %v1987_v2  ;;  %v1674_v40 = vadd.f32 %v1673_v31, %v3065_v45  ;;  %v1739_v33 = vadd.f32 %v1738_v28, %v1708_v18  ;;  %v3175_v59 = vrot.slane %v3099_v21, %v3009_v27  ;;  %v3177_v8 = vpop.f32.mrb[30].mxu1 }
 0x142   : > { %v2408_v1 = vpop.eup %2407  ;;  %2427 = vpow2.f32 %v1988_v3  ;;  %v1417_v16 = vadd.f32 1.0, %v2404_v11  ;;  %v1418_v4 = vadd.f32 1.0, %v2406_v60  ;;  %v3181_v0 = vpop.f32.mrb[31].mxu1  ;;  %v3186_v21 = vrot.slane %v3164_v58, %v3009_v27 }
 0x143   : > { %v2410_v30 = vpop.eup %2409  ;;  %2429 = vpow2.f32 %v1989_v6  ;;  %v1675_v45 = vadd.f32 %v1674_v40, %v3068_v42  ;;  %v1740_v2 = vadd.f32 %v1739_v33, %v1709_v19  ;;  %v1419_v31 = vadd.f32 1.0, %v2408_v1 }
 0x144   : > { %v2412_v18 = vpop.eup %2411  ;;  %2431 = vpow2.f32 %v1990_v7  ;;  %v1420_v3 = vadd.f32 1.0, %v2410_v30  ;;  %v3189_v28 = vrot.slane %v1174_v32, %v3009_v27  ;;  %v1243_v30 = vrot.slane %v3175_v59, %v2995_v15 }
 0x145   : > { %v2414_v11 = vpop.eup %2413  ;;  %2433 = vrcp.f32 %v1416_v26  ;;  %v1676_v60 = vadd.f32 %v1675_v45, %v3071_v43  ;;  %v1741_v20 = vadd.f32 %v1740_v2, %v1710_v29  ;;  %v3194_v6 = vpop.f32.mrb[6].mxu0  ;;  %v1421_v40 = vadd.f32 1.0, %v2412_v18 }
 0x146   : > { %v2416_v19 = vpop.eup %2415  ;;  %v1422_v33 = vadd.f32 1.0, %v2414_v11  ;;  %2435 = vrcp.f32 %v1417_v16  ;;  %v3198_v7 = vpop.f32.mrb[7].mxu0  ;;  %v1247_v29 = vrot.slane %v3189_v28, %v2995_v15  ;;  %v3205_v2 = vadd.f32 %v1243_v30, %v3025_v54 }
 0x147   : > { %v2418_v32 = vpop.eup %2417  ;;  %2437 = vrcp.f32 %v1418_v4  ;;  %v1677_v26 = vadd.f32 %v1676_v60, %v3076_v50  ;;  %v1742_v43 = vadd.f32 %v1741_v20, %v3117_v34  ;;  %v1423_v45 = vadd.f32 1.0, %v2416_v19 }
 0x148   : > { %v2420_v1 = vpop.eup %2419  ;;  %2439 = vrcp.f32 %v1419_v31  ;;  %v3208_v16 = vadd.f32 %v1243_v30, %v3020_v47  ;;  %v1424_v11 = vadd.f32 1.0, %v2418_v32  ;;  %v1991_v19 = vmul.f32 -1.442695, %v3205_v2 }
 0x149   : > { %v2422_v18 = vpop.eup %2421  ;;  %2441 = vrcp.f32 %v1420_v3  ;;  %v1678_v4 = vadd.f32 %v1677_v26, %v3079_v51  ;;  %v1743_v50 = vadd.f32 %v1742_v43, %v3123_v22  ;;  %v1425_v20 = vadd.f32 1.0, %v2420_v1 }
 0x14a   : > { %v2424_v34 = vpop.eup %2423  ;;  %v1426_v60 = vadd.f32 1.0, %v2422_v18  ;;  %2443 = vrcp.f32 %v1421_v40  ;;  %v1992_v30 = vmul.f32 -1.442695, %v3208_v16  ;;  %v3218_v51 = vmul.f32 %v3205_v2, %v3205_v2 }
 0x14b   : > { %v2426_v31 = vpop.eup %2425  ;;  %2445 = vrcp.f32 %v1422_v33  ;;  %v1679_v54 = vadd.f32 %v1678_v4, %v3082_v56  ;;  %v1744_v47 = vadd.f32 %v1743_v50, %v3127_v23  ;;  %v1427_v3 = vadd.f32 1.0, %v2424_v34 }
 0x14c   : > { %v2428_v32 = vpop.eup %2427  ;;  %v1428_v42 = vadd.f32 1.0, %v2426_v31  ;;  %2447 = vrcp.f32 %v1423_v45  ;;  %v3224_v56 = vmul.f32 %v3208_v16, %v3208_v16  ;;  %v3227_v43 = vadd.f32 %v1247_v29, %v3041_v9 }
 0x14d   : > { %v2430_v22 = vpop.eup %2429  ;;  %2449 = vrcp.f32 %v1424_v11  ;;  %v1680_v40 = vadd.f32 %v1679_v54, %v3085_v57  ;;  %v1745_v33 = vadd.f32 %v1744_v47, %v3131_v36  ;;  %v1429_v26 = vadd.f32 1.0, %v2428_v32 }
 0x14e   : > { %v2432_v23 = vpop.eup %2431  ;;  %2451 = vrcp.f32 %v1425_v20  ;;  %v1008_v1 = vadd.f32 %v2940_v35, %v3030_v61  ;;  %v1430_v18 = vadd.f32 1.0, %v2430_v22  ;;  %v1994_v50 = vmul.f32 -1.442695, %v3227_v43 }
 0x14f   : > { %v3231_v45 = vpop.eup %2433  ;;  %2453 = vrcp.f32 %v1426_v60  ;;  %v1681_v57 = vadd.f32 %v1680_v40, %v3090_v62  ;;  %v1746_v36 = vadd.f32 %v1745_v33, %v3137_v49  ;;  %v1431_v4 = vadd.f32 1.0, %v2432_v23 }
 0x150   : > { %v3235_v11 = vpop.eup %2435  ;;  %2455 = vrcp.f32 %v1427_v3  ;;  %v1094_v9 = vadd.f32 %v1008_v1, %v2945_v41  ;;  %v3244_v20 = vmul.f32 %v3227_v43, %v3227_v43  ;;  %v1023_v31 = vadd.f32 %v3046_v17, %v2940_v35 }
 0x151   : > { %v3239_v34 = vpop.eup %2437  ;;  %2457 = vrcp.f32 %v1428_v42  ;;  %v1747_v61 = vadd.f32 %v1746_v36, %v3141_v52  ;;  %v1682_v62 = vadd.f32 %v1681_v57, %v3092_v5  ;;  %v3421_v54 = vcombine.high %v3175_v59, %v3175_v59 }
 0x152   : > { %v3247_v49 = vpop.eup %2439  ;;  %2459 = vrcp.f32 %v1429_v26  ;;  %v1306_v60 = vadd.f32 %v1247_v29, %v1094_v9  ;;  %v1018_v5 = vadd.f32 %v2940_v35, %v3052_v24  ;;  %v1721_v17 = vmul.f32 %v3094_v48, %v3094_v48 }
 0x153   : > { %v1251_v42 = vrot.slane %v3421_v54, %v2995_v15  ;;  %v3255_v47 = vpop.eup %2441  ;;  %2461 = vrcp.f32 %v1430_v18  ;;  %v1748_v52 = vadd.f32 %v1747_v61, %v3147_v53  ;;  %v1683_v32 = vadd.f32 %v1682_v62, %v3094_v48 }
 0x154   : > { %v3261_v3 = vpop.eup %2443  ;;  %2463 = vrcp.f32 %v1431_v4  ;;  %v1993_v29 = vmul.f32 -1.442695, %v1306_v60  ;;  %v1097_v59 = vadd.f32 %v1023_v31, %v2942_v37  ;;  %v1096_v33 = vadd.f32 %v1018_v5, %v2945_v41 }
 0x155   : > { %v3266_v22 = vpop.eup %2445  ;;  %v1749_v40 = vadd.f32 %v1748_v52, %v3151_v12  ;;  %2465 = vpow2.f32 %v1991_v19  ;;  %v1684_v53 = vadd.f32 %v1683_v32, %v3205_v2  ;;  %v1033_v26 = vadd.f32 %v3073_v46, %v2940_v35 }
 0x156   : > { %v3271_v23 = vpop.eup %2447  ;;  %2467 = vpow2.f32 %v1992_v30  ;;  %v1309_v24 = vadd.f32 %v1251_v42, %v1097_v59  ;;  %v1206_v48 = vcombine.high %v3189_v28, %v3189_v28  ;;  %v1308_v2 = vadd.f32 %v1251_v42, %v1096_v33 }
 0x157   : > { %v3277_v1 = vpop.eup %2449  ;;  %v1750_v18 = vadd.f32 %v1749_v40, %v3155_v39  ;;  %2469 = vpow2.f32 %v1994_v50  ;;  %v1685_v12 = vadd.f32 %v1684_v53, %v3208_v16  ;;  %v1724_v57 = vmul.f32 %v1306_v60, %v1306_v60 }
 0x158   : > { %v3281_v19 = vpop.eup %2451  ;;  %2471 = vpow2.f32 %v1993_v29  ;;  %v1996_v30 = vmul.f32 -1.442695, %v1309_v24  ;;  %v1099_v36 = vadd.f32 %v1033_v26, %v2942_v37  ;;  %v3287_v9 = vmul.f32 %v1309_v24, %v1309_v24 }
 0x159   : > { %v3284_v4 = vpop.eup %2453  ;;  %v1686_v46 = vadd.f32 %v1685_v12, %v1306_v60  ;;  %v1751_v28 = vadd.f32 %v1750_v18, %v3168_v10  ;;  %v1995_v61 = vmul.f32 -1.442695, %v1308_v2  ;;  %v1255_v16 = vrot.slane %v1206_v48, %v2995_v15 }
 0x15a   : > { %v3289_v39 = vpop.eup %2455  ;;  %2473 = vpow2.f32 %v1996_v30  ;;  %v1028_v50 = vadd.f32 %v2940_v35, %v3087_v63  ;;  %v1043_v62 = vadd.f32 %v3111_v14, %v2940_v35  ;;  %v1259_v60 = vrot.slane %v3186_v21, %v2995_v15 }
 0x15b   : > { %v3296_v31 = vpop.eup %2457  ;;  %v1752_v54 = vadd.f32 %v1751_v28, %v1721_v17  ;;  %2475 = vpow2.f32 %v1995_v61  ;;  %v1687_v10 = vadd.f32 %v1686_v46, %v3227_v43  ;;  %v1311_v52 = vadd.f32 %v1255_v16, %v1099_v36 }
 0x15c   : > { %v3301_v42 = vpop.eup %2459  ;;  %v1098_v32 = vadd.f32 %v1028_v50, %v2945_v41  ;;  %v1101_v5 = vadd.f32 %v1043_v62, %v2942_v37  ;;  %v1038_v63 = vadd.f32 %v2940_v35, %v3113_v25  ;;  %v1726_v59 = vmul.f32 %v1308_v2, %v1308_v2 }
 0x15d   : > { %v3307_v14 = vpop.eup %2461  ;;  %v1753_v29 = vadd.f32 %v1752_v54, %v3218_v51  ;;  %v1688_v17 = vadd.f32 %v1687_v10, %v1308_v2  ;;  %v1053_v43 = vadd.f32 %v3119_v44, %v2940_v35  ;;  %v1998_v53 = vmul.f32 -1.442695, %v1311_v52 }
 0x15e   : > { %v3312_v40 = vpop.eup %2463  ;;  %v1310_v33 = vadd.f32 %v1255_v16, %v1098_v32  ;;  %v1313_v26 = vadd.f32 %v1259_v60, %v1101_v5  ;;  %v3422_v48 = vcombine.high %v3164_v58, %v3164_v58  ;;  %v1100_v2 = vadd.f32 %v1038_v63, %v2945_v41 }
 0x15f   : > { %v2466_v25 = vpop.eup %2465  ;;  %v1754_v12 = vadd.f32 %v1753_v29, %v3224_v56  ;;  %v1689_v51 = vadd.f32 %v1688_v17, %v1309_v24  ;;  %v1103_v30 = vadd.f32 %v1053_v43, %v2942_v37  ;;  %2477 = vpow2.f32 %v1998_v53 }
 0x160   : > { %v3318_v18 = vrot.slane %v3422_v48, %v3009_v27  ;;  %v2468_v44 = vpop.eup %2467  ;;  %v1432_v36 = vadd.f32 1.0, %v2466_v25  ;;  %v1729_v46 = vmul.f32 %v1311_v52, %v1311_v52  ;;  %v1997_v28 = vmul.f32 -1.442695, %v1310_v33 }
 0x161   : > { %v2470_v61 = vpop.eup %2469  ;;  %v1433_v16 = vadd.f32 1.0, %v2468_v44  ;;  %v1755_v50 = vadd.f32 %v1754_v12, %v1724_v57  ;;  %v1690_v62 = vadd.f32 %v1689_v51, %v1310_v33  ;;  %v1728_v58 = vmul.f32 %v1310_v33, %v1310_v33 }
 0x162   : > { %v2472_v27 = vpop.eup %2471  ;;  %2479 = vrcp.f32 %v1432_v36  ;;  %v1435_v54 = vadd.f32 1.0, %v2470_v61  ;;  %v2000_v10 = vmul.f32 -1.442695, %v1313_v26  ;;  %v1312_v56 = vadd.f32 %v1259_v60, %v1100_v2 }
 0x163   : > { %2481 = vrcp.f32 %v1433_v16  ;;  %v1434_v24 = vadd.f32 1.0, %v2472_v27  ;;  %v1756_v32 = vadd.f32 %v1755_v50, %v3244_v20  ;;  %v1691_v5 = vadd.f32 %v1690_v62, %v1311_v52 }
 0x164   : > { %v2474_v63 = vpop.eup %2473  ;;  %2483 = vrcp.f32 %v1435_v54  ;;  %v1731_v29 = vmul.f32 %v1313_v26, %v1313_v26  ;;  %v1999_v17 = vmul.f32 -1.442695, %v1312_v56  ;;  %v1263_v43 = vrot.slane %v3318_v18, %v2995_v15 }
 0x165   : > { %v2476_v57 = vpop.eup %2475  ;;  %2485 = vrcp.f32 %v1434_v24  ;;  %v1437_v53 = vadd.f32 1.0, %v2474_v63  ;;  %v1757_v33 = vadd.f32 %v1756_v32, %v1726_v59  ;;  %v1692_v48 = vadd.f32 %v1691_v5, %v1312_v56 }
 0x166   : > { %v1436_v25 = vadd.f32 1.0, %v2476_v57  ;;  %2487 = vpow2.f32 %v1997_v28  ;;  %v1315_v60 = vadd.f32 %v1263_v43, %v1103_v30  ;;  %v1048_v12 = vadd.f32 %v2940_v35, %v3133_v38 }
 0x167   : > { %2489 = vrcp.f32 %v1437_v53  ;;  %v1758_v20 = vadd.f32 %v1757_v33, %v3287_v9  ;;  %v1693_v52 = vadd.f32 %v1692_v48, %v1313_v26  ;;  %v1063_v51 = vadd.f32 %v3143_v13, %v2940_v35 }
 0x168   : > { %2491 = vrcp.f32 %v1436_v25  ;;  %v1730_v2 = vmul.f32 %v1312_v56, %v1312_v56  ;;  %v2002_v44 = vmul.f32 -1.442695, %v1315_v60  ;;  %v1102_v36 = vadd.f32 %v1048_v12, %v2945_v41 }
 0x169   : > { %v1759_v59 = vadd.f32 %v1758_v20, %v1728_v58  ;;  %2493 = vpow2.f32 %v2000_v10  ;;  %v1105_v28 = vadd.f32 %v1063_v51, %v2942_v37  ;;  %v1205_v30 = vcombine.high %v3186_v21, %v3186_v21  ;;  %v2478_v38 = vpop.eup %2477 }
 0x16a   : > { %2495 = vpow2.f32 %v1999_v17  ;;  %v1314_v61 = vadd.f32 %v1263_v43, %v1102_v36  ;;  %v1058_v9 = vadd.f32 %v2940_v35, %v3157_v55  ;;  %v1073_v13 = vadd.f32 %v3177_v8, %v2940_v35 }
 0x16b   : > { %v1439_v26 = vadd.f32 1.0, %v2478_v38  ;;  %v1760_v16 = vadd.f32 %v1759_v59, %v1729_v46  ;;  %2497 = vpow2.f32 %v2002_v44  ;;  %v1267_v50 = vrot.slane %v1205_v30, %v2995_v15 }
 0x16c   : > { %v2480_v62 = vpop.eup %2479  ;;  %v1733_v58 = vmul.f32 %v1315_v60, %v1315_v60  ;;  %v2001_v27 = vmul.f32 -1.442695, %v1314_v61  ;;  %v1694_v54 = vadd.f32 %v1693_v52, %v1314_v61  ;;  %v1104_v21 = vadd.f32 %v1058_v9, %v2945_v41 }
 0x16d   : > { %v2482_v10 = vpop.eup %2481  ;;  %v1761_v56 = vadd.f32 %v1760_v16, %v1730_v2  ;;  %v1732_v24 = vmul.f32 %v1314_v61, %v1314_v61  ;;  %v1317_v32 = vadd.f32 %v1267_v50, %v1105_v28  ;;  %v1107_v55 = vadd.f32 %v1073_v13, %v2942_v37 }
 0x16e   : > { %v2484_v5 = vpop.eup %2483  ;;  %2499 = vpow2.f32 %v2001_v27  ;;  %v1316_v8 = vadd.f32 %v1267_v50, %v1104_v21  ;;  %v1695_v63 = vadd.f32 %v1694_v54, %v1315_v60  ;;  %v1207_v46 = vcombine.high %v3318_v18, %v3318_v18 }
 0x16f   : > { %v2486_v17 = vpop.eup %2485  ;;  %2501 = vrcp.f32 %v1439_v26  ;;  %v1762_v43 = vadd.f32 %v1761_v56, %v1731_v29  ;;  %v2004_v57 = vmul.f32 -1.442695, %v1317_v32  ;;  %v1068_v53 = vadd.f32 %v2940_v35, %v3181_v0 }
 0x170   : > { %v2488_v33 = vpop.eup %2487  ;;  %v1575_v48 = vadd.f32 %v2486_v17, %v2484_v5  ;;  %v1735_v25 = vmul.f32 %v1317_v32, %v1317_v32  ;;  %v2003_v12 = vmul.f32 -1.442695, %v1316_v8  ;;  %v1696_v20 = vadd.f32 %v1695_v63, %v1316_v8 }
 0x171   : > { %v2490_v37 = vpop.eup %2489  ;;  %v1438_v52 = vadd.f32 1.0, %v2488_v33  ;;  %v1763_v51 = vadd.f32 %v1762_v43, %v1732_v24  ;;  %2503 = vpow2.f32 %v2004_v57  ;;  %v1271_v60 = vrot.slane %v1207_v46, %v2995_v15 }
 0x172   : > { %v2492_v2 = vpop.eup %2491  ;;  %2505 = vpow2.f32 %v2003_v12  ;;  %v1734_v18 = vmul.f32 %v1316_v8, %v1316_v8  ;;  %v1106_v29 = vadd.f32 %v1068_v53, %v2945_v41  ;;  %v1697_v44 = vadd.f32 %v1696_v20, %v1317_v32 }
 0x173   : > { %v2494_v36 = vpop.eup %2493  ;;  %v1582_v59 = vadd.f32 %v2492_v2, %v2490_v37  ;;  %2507 = vrcp.f32 %v1438_v52  ;;  %v1764_v35 = vadd.f32 %v1763_v51, %v1733_v58  ;;  %v1319_v0 = vadd.f32 %v1271_v60, %v1107_v55 }
 0x174   : > { %v2496_v28 = vpop.eup %2495  ;;  %v1576_v30 = vrot.slane %v1575_v48, 4  ;;  %v1441_v38 = vadd.f32 1.0, %v2494_v36  ;;  %v1318_v61 = vadd.f32 %v1271_v60, %v1106_v29  ;;  %v1568_v9 = vadd.f32 %v2482_v10, %v2480_v62 }
 0x175   : > { %v2498_v13 = vpop.eup %2497  ;;  %v1440_v26 = vadd.f32 1.0, %v2496_v28  ;;  %v1765_v16 = vadd.f32 %v1764_v35, %v1734_v18  ;;  %v2006_v15 = vmul.f32 -1.442695, %v1319_v0  ;;  %v1737_v50 = vmul.f32 %v1319_v0, %v1319_v0 }
 0x176   : > { %2509 = vrcp.f32 %v1441_v38  ;;  %v1443_v27 = vadd.f32 1.0, %v2498_v13  ;;  %v2005_v54 = vmul.f32 -1.442695, %v1318_v61  ;;  %v1698_v41 = vadd.f32 %v1697_v44, %v1318_v61 }
 0x177   : > { %2511 = vrcp.f32 %v1440_v26  ;;  %v1736_v21 = vmul.f32 %v1318_v61, %v1318_v61  ;;  %v1766_v56 = vadd.f32 %v1765_v16, %v1735_v25  ;;  %v1569_v24 = vrot.slane %v1568_v9, 4 }
 0x178   : > { %v2500_v58 = vpop.eup %2499  ;;  %2513 = vrcp.f32 %v1443_v27  ;;  %v1699_v32 = vadd.f32 %v1698_v41, %v1319_v0  ;;  %v1577_v55 = vadd.f32 %v1576_v30, %v1575_v48  ;;  %v1583_v5 = vrot.slane %v1582_v59, 4 }
 0x179   : > { %v2502_v8 = vpop.eup %2501  ;;  %v1442_v62 = vadd.f32 1.0, %v2500_v58  ;;  %2515 = vpow2.f32 %v2006_v15  ;;  %v1767_v10 = vadd.f32 %v1766_v56, %v1736_v21  ;;  %v1570_v63 = vadd.f32 %v1569_v24, %v1568_v9 }
 0x17a   : > { %2517 = vpow2.f32 %v2005_v54  ;;  %v1700_v46 = vrot.slane %v1699_v32, 4  ;;  %v1578_v17 = vrot.slane %v1577_v55, 2  ;;  %v1584_v43 = vadd.f32 %v1583_v5, %v1582_v59 }
 0x17b   : > { %v2504_v57 = vpop.eup %2503  ;;  %2519 = vrcp.f32 %v1442_v62  ;;  %v1768_v53 = vadd.f32 %v1767_v10, %v1737_v50  ;;  %v1571_v33 = vrot.slane %v1570_v63, 2  ;;  %v1512_v18 = vadd.f32 %v3235_v11, %v3231_v45 }
 0x17c   : > { %v2506_v25 = vpop.eup %2505  ;;  %v1445_v12 = vadd.f32 1.0, %v2504_v57  ;;  %v1701_v20 = vadd.f32 %v1700_v46, %v1699_v32  ;;  %v1579_v48 = vadd.f32 %v1578_v17, %v1577_v55  ;;  %v1585_v37 = vrot.slane %v1584_v43, 2 }
 0x17d   : > { %v2508_v52 = vpop.eup %2507  ;;  %v1444_v51 = vadd.f32 1.0, %v2506_v25  ;;  %v1769_v60 = vrot.slane %v1768_v53, 4  ;;  %v1572_v2 = vadd.f32 %v1571_v33, %v1570_v63  ;;  %v1513_v9 = vrot.slane %v1512_v18, 4 }
 0x17e   : > { %2521 = vrcp.f32 %v1445_v12  ;;  %v1702_v29 = vrot.slane %v1701_v20, 2  ;;  %v1580_v44 = vrot.slane %v1579_v48, 1  ;;  %v1586_v36 = vadd.f32 %v1585_v37, %v1584_v43 }
 0x17f   : > { %2523 = vrcp.f32 %v1444_v51  ;;  %v1770_v59 = vadd.f32 %v1769_v60, %v1768_v53  ;;  %v1573_v35 = vrot.slane %v1572_v2, 1  ;;  %v1589_v0 = vadd.f32 %v2508_v52, %v2502_v8 }
 0x180   : > { %v2510_v28 = vpop.eup %2509  ;;  %v1703_v30 = vadd.f32 %v1702_v29, %v1701_v20  ;;  %v1581_v38 = vadd.f32 %v1580_v44, %v1579_v48  ;;  %v1587_v61 = vrot.slane %v1586_v36, 1  ;;  %v1519_v45 = vadd.f32 %v3247_v49, %v3239_v34 }
 0x181   : > { %v2512_v13 = vpop.eup %2511  ;;  %v1771_v26 = vrot.slane %v1770_v59, 2  ;;  %v1574_v16 = vadd.f32 %v1573_v35, %v1572_v2  ;;  %v1590_v15 = vrot.slane %v1589_v0, 4  ;;  %v1514_v41 = vadd.f32 %v1513_v9, %v1512_v18 }
 0x182   : > { %v2514_v11 = vpop.eup %2513  ;;  %v1704_v50 = vrot.slane %v1703_v30, 1  ;;  %v1588_v27 = vadd.f32 %v1587_v61, %v1586_v36  ;;  %v1596_v54 = vadd.f32 %v2512_v13, %v2510_v28  ;;  %v1520_v32 = vrot.slane %v1519_v45, 4 }
 0x183   : > { %v2516_v21 = vpop.eup %2515  ;;  %v1772_v56 = vadd.f32 %v1771_v26, %v1770_v59  ;;  %v1591_v24 = vadd.f32 %v1590_v15, %v1589_v0  ;;  %v1654_v58 = vsel %vm1640_vm0, %v1581_v38, %v1574_v16  ;;  %v1515_v17 = vrot.slane %v1514_v41, 2 }
 0x184   : > { %v2518_v55 = vpop.eup %2517  ;;  %v1447_v5 = vadd.f32 1.0, %v2516_v21  ;;  %v1705_v8 = vadd.f32 %v1704_v50, %v1703_v30  ;;  %v1597_v62 = vrot.slane %v1596_v54, 4  ;;  %v1655_v10 = vsel %vm1642_vm1, %v1588_v27, %v1654_v58 }
 0x185   : > { %v2520_v63 = vpop.eup %2519  ;;  %v1446_v34 = vadd.f32 1.0, %v2518_v55  ;;  %v1773_v49 = vrot.slane %v1772_v56, 1  ;;  %v1592_v46 = vrot.slane %v1591_v24, 2  ;;  %v1521_v53 = vadd.f32 %v1520_v32, %v1519_v45 }
 0x186   : > { %2525 = vrcp.f32 %v1447_v5  ;;  %v1598_v43 = vadd.f32 %v1597_v62, %v1596_v54  ;;  %v1603_v57 = vadd.f32 %v2520_v63, %v2514_v11  ;;  %v1516_v12 = vadd.f32 %v1515_v17, %v1514_v41 }
 0x187   : > { %2527 = vrcp.f32 %v1446_v34  ;;  %v1774_v33 = vadd.f32 %v1773_v49, %v1772_v56  ;;  %v1593_v25 = vadd.f32 %v1592_v46, %v1591_v24  ;;  %v1522_v52 = vrot.slane %v1521_v53, 2 }
 0x188   : > { %v2522_v20 = vpop.eup %2521  ;;  %v1599_v48 = vrot.slane %v1598_v43, 2  ;;  %v1604_v37 = vrot.slane %v1603_v57, 4  ;;  %v1526_v51 = vadd.f32 %v3261_v3, %v3255_v47  ;;  %v1517_v29 = vrot.slane %v1516_v12, 1 }
 0x189   : > { %v2524_v60 = vpop.eup %2523  ;;  %v3357_v2 = vsel %vm1791_vm2, %v1705_v8, %v1774_v33  ;;  %v1594_v18 = vrot.slane %v1593_v25, 1  ;;  %v1533_v44 = vadd.f32 %v3271_v23, %v3266_v22  ;;  %v1523_v0 = vadd.f32 %v1522_v52, %v1521_v53 }
 0x18a   : > { %v1600_v36 = vadd.f32 %v1599_v48, %v1598_v43  ;;  %v1605_v59 = vadd.f32 %v1604_v37, %v1603_v57  ;;  %v1610_v35 = vadd.f32 %v2524_v60, %v2522_v20  ;;  %v1518_v30 = vadd.f32 %v1517_v29, %v1516_v12 }
 0x18b   : > { %v1595_v28 = vadd.f32 %v1594_v18, %v1593_v25  ;;  %v1527_v38 = vrot.slane %v1526_v51, 4  ;;  %v1534_v61 = vrot.slane %v1533_v44, 4  ;;  %v1524_v13 = vrot.slane %v1523_v0, 1 }
 0x18c   : > { %v1601_v9 = vrot.slane %v1600_v36, 1  ;;  %v1606_v47 = vrot.slane %v1605_v59, 2  ;;  %v1611_v3 = vrot.slane %v1610_v35, 4  ;;  %v1540_v22 = vadd.f32 %v3281_v19, %v3277_v1 }
 0x18d   : > { %v1656_v26 = vsel %vm1644_vm3, %v1595_v28, %v1655_v10  ;;  %v1528_v16 = vadd.f32 %v1527_v38, %v1526_v51  ;;  %v1535_v15 = vadd.f32 %v1534_v61, %v1533_v44  ;;  %v1525_v50 = vadd.f32 %v1524_v13, %v1523_v0 }
 0x18e   : > { %v1602_v23 = vadd.f32 %v1601_v9, %v1600_v36  ;;  %v1607_v45 = vadd.f32 %v1606_v47, %v1605_v59  ;;  %v1612_v11 = vadd.f32 %v1611_v3, %v1610_v35  ;;  %v1541_v41 = vrot.slane %v1540_v22, 4 }
 0x18f   : > { %v1529_v27 = vrot.slane %v1528_v16, 2  ;;  %v1536_v54 = vrot.slane %v1535_v15, 2  ;;  %v1547_v21 = vadd.f32 %v3289_v39, %v3284_v4  ;;  %v1554_v55 = vadd.f32 %v3301_v42, %v3296_v31 }
 0x190   : > { %v2526_v56 = vpop.eup %2525  ;;  %v1608_v24 = vrot.slane %v1607_v45, 1  ;;  %v1613_v58 = vrot.slane %v1612_v11, 2  ;;  %v1657_v32 = vsel %vm1646_vm4, %v1602_v23, %v1656_v26  ;;  %v1542_v8 = vadd.f32 %v1541_v41, %v1540_v22 }
 0x191   : > { %v2528_v5 = vpop.eup %2527  ;;  %v1530_v1 = vadd.f32 %v1529_v27, %v1528_v16  ;;  %v1537_v19 = vadd.f32 %v1536_v54, %v1535_v15  ;;  %v1548_v62 = vrot.slane %v1547_v21, 4  ;;  %v1555_v49 = vrot.slane %v1554_v55, 4 }
 0x192   : > { %v1609_v10 = vadd.f32 %v1608_v24, %v1607_v45  ;;  %v1614_v63 = vadd.f32 %v1613_v58, %v1612_v11  ;;  %v1617_v34 = vadd.f32 %v2528_v5, %v2526_v56  ;;  %v1543_v4 = vrot.slane %v1542_v8, 2  ;;  %v3425_v58 = vld [vmem:[#allocation4_spill] sm:$0xff] }
 0x193   : > { %v1531_v46 = vrot.slane %v1530_v1, 1  ;;  %v1538_v17 = vrot.slane %v1537_v19, 1  ;;  %v1549_v39 = vadd.f32 %v1548_v62, %v1547_v21  ;;  %v1556_v33 = vadd.f32 %v1555_v49, %v1554_v55 }
 0x194   : > { %v1615_v43 = vrot.slane %v1614_v63, 1  ;;  %v1618_v57 = vrot.slane %v1617_v34, 4  ;;  %v1658_v53 = vsel %vm1648_vm5, %v1609_v10, %v1657_v32  ;;  %v1544_v42 = vadd.f32 %v1543_v4, %v1542_v8 }
 0x195   : > { %v1532_v25 = vadd.f32 %v1531_v46, %v1530_v1  ;;  %v1539_v31 = vadd.f32 %v1538_v17, %v1537_v19  ;;  %v1550_v12 = vrot.slane %v1549_v39, 2  ;;  %v1557_v37 = vrot.slane %v1556_v33, 2  ;;  %v3426_v1 = vld [vmem:[#allocation3_spill] sm:$0xff] }
 0x196   : > { %v1616_v20 = vadd.f32 %v1615_v43, %v1614_v63  ;;  %v1619_v48 = vadd.f32 %v1618_v57, %v1617_v34  ;;  %v1561_v52 = vadd.f32 %v3312_v40, %v3307_v14  ;;  %v1545_v51 = vrot.slane %v1544_v42, 1  ;;  %v2529_v14 = vld [vmem:[%s3414_s8] sm:$0x7] }
 0x197   : > { %v1551_v60 = vadd.f32 %v1550_v12, %v1549_v39  ;;  %v1641_v18 = vsel %vm1640_vm0, %v1525_v50, %v1518_v30  ;;  %v1558_v36 = vadd.f32 %v1557_v37, %v1556_v33  ;;  %v3423_v40 = vld [vmem:[#allocation2_spill] sm:$0xff] }
 0x198   : > { %v1620_v29 = vrot.slane %v1619_v48, 2  ;;  %v1659_v44 = vsel %vm1650_vm6, %v1616_v20, %v1658_v53  ;;  %v1562_v59 = vrot.slane %v1561_v52, 4  ;;  %v1546_v35 = vadd.f32 %v1545_v51, %v1544_v42 }
 0x199   : > { %v1552_v0 = vrot.slane %v1551_v60, 1  ;;  %v1643_v28 = vsel %vm1642_vm1, %v1532_v25, %v1641_v18  ;;  %v1559_v61 = vrot.slane %v1558_v36, 1  ;;  %v3424_v30 = vsub.s32 2, %v3423_v40 }
 0x19a   : > { %v1621_v38 = vadd.f32 %v1620_v29, %v1619_v48  ;;  %v1563_v9 = vadd.f32 %v1562_v59, %v1561_v52  ;;  %v1645_v47 = vsel %vm1644_vm3, %v1539_v31, %v1643_v28 }
 0x19b   : > { %v672_v3 = vrot.slane %v2529_v14, %v3424_v30  ;;  %v1553_v13 = vadd.f32 %v1552_v0, %v1551_v60  ;;  %v1647_v26 = vsel %vm1646_vm4, %v1546_v35, %v1645_v47  ;;  %v1560_v15 = vadd.f32 %v1559_v61, %v1558_v36 }
 0x19c   : > { %v1622_v16 = vrot.slane %v1621_v38, 1  ;;  %v1564_v22 = vrot.slane %v1563_v9, 2 }
 0x19d   : > { %v825_v23 = vadd.f32 %v3194_v6, %v672_v3  ;;  %v1649_v45 = vsel %vm1648_vm5, %v1553_v13, %v1647_v26  ;;  %v820_v56 = vadd.f32 %v3198_v7, %v672_v3 }
 0x19e   : > { %v1623_v11 = vadd.f32 %v1622_v16, %v1621_v38  ;;  %v1565_v50 = vadd.f32 %v1564_v22, %v1563_v9  ;;  %v1651_v27 = vsel %vm1650_vm6, %v1560_v15, %v1649_v45 }
 0x1a0   : > { %v1660_v54 = vsel %vm1652_vm7, %v1623_v11, %v1659_v44  ;;  %v1566_v41 = vrot.slane %v1565_v50, 1 }
 0x1a1   : > { %v1664_v21 = vmul.f32 %v1660_v54, %v825_v23 }
 0x1a2   : > { %v1567_v24 = vadd.f32 %v1566_v41, %v1565_v50 }
 0x1a3   : > { %v1666_v32 = vadd.f32 %v1664_v21, %v3425_v58 }
 0x1a4   : > { %v1653_v6 = vsel %vm1652_vm7, %v1567_v24, %v1651_v27 }
 0x1a5   : > { %1668 = vst [vmem:[%s468_s30 + $0x8] sm:$0xff] %v1666_v32  ;;  %v1663_v55 = vmul.f32 %v1653_v6, %v820_v56  ;;  %v1783_v5 = vmul.f32 %v1666_v32, %v1666_v32 }
 0x1a7   : > { %v1665_v19 = vadd.f32 %v1663_v55, %v3426_v1 }
 0x1a9   : > { %1667 = vst [vmem:[%s468_s30] sm:$0xff] %v1665_v19  ;;  %v1775_v8 = vadd.f32 %v1666_v32, %v1665_v19  ;;  %v1782_v62 = vmul.f32 %v1665_v19, %v1665_v19 }
 0x1ab   : > { %v1776_v10 = vrot.slane %v1775_v8, 4  ;;  %v1784_v63 = vadd.f32 %v1783_v5, %v1782_v62 }
 0x1ad   : > { %v1777_v7 = vadd.f32 %v1776_v10, %v1775_v8  ;;  %v1785_v34 = vrot.slane %v1784_v63, 4 }
 0x1af   : > { %v1778_v49 = vrot.slane %v1777_v7, 2  ;;  %v1786_v46 = vadd.f32 %v1785_v34, %v1784_v63 }
 0x1b1   : > { %v1779_v17 = vadd.f32 %v1778_v49, %v1777_v7  ;;  %v1787_v4 = vrot.slane %v1786_v46, 2 }
 0x1b3   : > { %v1780_v39 = vrot.slane %v1779_v17, 1  ;;  %v1788_v43 = vadd.f32 %v1787_v4, %v1786_v46 }
 0x1b5   : > { %v1781_v57 = vadd.f32 %v1780_v39, %v1779_v17  ;;  %v1789_v53 = vrot.slane %v1788_v43, 1 }
 0x1b7   : > { %v1790_v33 = vadd.f32 %v1789_v53, %v1788_v43  ;;  %v1794_v25 = vsel %vm1793_vm8, %v3357_v2, %v1781_v57 }
 0x1b9   : > { %v1796_v31 = vsel %vm1795_vm9, %v1794_v25, %v1790_v33 }
 0x1ba   : > { %1797 = vst [vmem:[%s476_s26] sm:$0xf] %v1796_v31 }
 0x1bb PF: > { %s21_s15 = sadd.s32 1, %s2552_s15   ;;  %s3427_s13 = smov %s2548_s14 }
 0x1bc   : > { %p18_p5 = scmp.ge.s32.totalorder %s21_s15, 4   ;;  %s3428_s14 = smov %s3430_s16 }
 0x1be   :  { %20 = sbr.rel (!%p18_p5) target bundleno = 2 (0x2), region = 104 }

</bundles_post_ra>
